<compile_context>
chip_gen: v7x
topology: tpu7x:2x2x1
jax: 0.10.0
libtpu: 0.0.40
codegen_flags: <defaults>
</compile_context>

<pallas_src>
import functools
import math

import jax
import jax.numpy as jnp
from jax.experimental import pallas as pl
from jax.experimental.pallas import tpu as pltpu


# ----------------------------- in-kernel helpers -----------------------------

def _layer_norm(x, gamma, beta, eps=1e-5):
    # x: (N, D) f32; gamma/beta: (1, D).  Matches torch.nn.LayerNorm(d_model) defaults.
    mean = jnp.mean(x, axis=-1, keepdims=True)
    var = jnp.mean((x - mean) ** 2, axis=-1, keepdims=True)
    return (x - mean) * jax.lax.rsqrt(var + eps) * gamma + beta


# --------------------------- fused encoder-stack kernel ----------------------

def encoder_stack_kernel(x_ref,
                         wqkv_ref, bqkv_ref, wo_ref, bo_ref,
                         w1_ref, b1_ref, w2_ref, b2_ref,
                         g1_ref, be1_ref, g2_ref, be2_ref,
                         gf_ref, bf_ref,
                         o_ref, *, h, n_seq, seq_len, d_model):
    layer = pl.program_id(1)
    last = pl.num_programs(1) - 1
    n_rows = n_seq * seq_len
    dk = d_model // h

    # Seed the resident activation: o_ref's block index is constant across the
    # layer axis, so it stays in VMEM and is written back once per batch tile.
    @pl.when(layer == 0)
    def _():
        o_ref[...] = x_ref[...]

    x = o_ref[...].astype(jnp.float32)                 # (N, D) f32 residual stream
    xb = x.astype(jnp.bfloat16)

    # ---- fused Q/K/V projection: one MXU push with N = 3*D ----
    # The 1/sqrt(dk) attention scale is folded into the Q third of wqkv/bqkv on host.
    qkv = (jnp.dot(xb, wqkv_ref[0], preferred_element_type=jnp.float32)
           + bqkv_ref[0]).astype(jnp.bfloat16)         # (N, 3D) bf16
    q3 = qkv[:, 0:d_model].reshape(n_seq, seq_len, d_model)
    k3 = qkv[:, d_model:2 * d_model].reshape(n_seq, seq_len, d_model)
    v3 = qkv[:, 2 * d_model:3 * d_model].reshape(n_seq, seq_len, d_model)

    # ---- Multi-Head Self-Attention (Q = K = V, no mask, dropout == identity) ----
    # TODO(synk): src_mask support omitted (forward is exercised with mask=None).
    # TODO(synk): for large h, fold the head axis into the dot_general batch dims
    # (or a fori_loop over pl.ds lane slices) instead of the static Python unroll.
    heads = []
    for hd in range(h):
        sl = slice(hd * dk, (hd + 1) * dk)
        qh = q3[:, :, sl]                              # (n_seq, S, dk) bf16
        kh = k3[:, :, sl]
        vh = v3[:, :, sl]
        # scores = qh @ kh^T without an explicit transpose: contract the dk dims.
        s = jax.lax.dot_general(qh, kh, (((2,), (2,)), ((0,), (0,))),
                                preferred_element_type=jnp.float32)   # (n_seq, S, S)
        s = s - jnp.max(s, axis=-1, keepdims=True)
        e = jnp.exp(s)
        p = e * pl.reciprocal(jnp.sum(e, axis=-1, keepdims=True), approx=True)
        pv = jax.lax.dot_general(p.astype(jnp.bfloat16), vh,
                                 (((2,), (1,)), ((0,), (0,))),
                                 preferred_element_type=jnp.float32)  # (n_seq, S, dk)
        heads.append(pv.astype(jnp.bfloat16))
    # Concatenated heads -> a single K=D matmul through W_o (not h K=dk matmuls).
    attn_cat = jnp.concatenate(heads, axis=-1).reshape(n_rows, d_model)
    attn = jnp.dot(attn_cat, wo_ref[0],
                   preferred_element_type=jnp.float32) + bo_ref[0]

    # residual + norm1
    x1 = _layer_norm(x + attn, g1_ref[0], be1_ref[0])

    # ---- Position-wise Feed-Forward ----
    # TODO(synk): for very large d_ff, tile over d_ff chunks (accumulate the w2 dot)
    # to cap the (rows, d_ff) intermediate on v7x's 64 MiB VMEM.
    ffh = jnp.dot(x1.astype(jnp.bfloat16), w1_ref[0],
                  preferred_element_type=jnp.float32) + b1_ref[0]
    ffh = jnp.maximum(ffh, 0.0).astype(jnp.bfloat16)
    ff = jnp.dot(ffh, w2_ref[0], preferred_element_type=jnp.float32) + b2_ref[0]

    # residual + norm2
    x2 = _layer_norm(x1 + ff, g2_ref[0], be2_ref[0])

    @pl.when(layer < last)
    def _():
        o_ref[...] = x2.astype(o_ref.dtype)            # carry to the next layer step

    @pl.when(layer == last)
    def _():
        # Final Encoder LayerNorm fused into the last layer iteration.
        o_ref[...] = _layer_norm(x2, gf_ref[...], bf_ref[...]).astype(o_ref.dtype)


# ------------------------------ host-side helpers ------------------------------

def _pick_seqs_per_block(batch, seq_len, target_rows=512):
    """Largest divisor of `batch` whose row block stays <= target_rows while keeping
    >= 2 batch tiles (so v7x's second TensorCore gets work and the activation-block
    pipeline actually runs)."""
    best = 1
    for d in range(1, batch + 1):
        if batch % d:
            continue
        if d * seq_len <= target_rows and (batch // d >= 2 or batch == 1):
            best = d
    return best


def _pick_vmem_limit_bytes():
    cap = 128 * 1024 * 1024
    try:
        cap = int(getattr(pltpu.get_tpu_info(), "vmem_capacity_bytes", cap) or cap)
    except Exception:
        pass
    # ~12 MiB headroom for compiler temporaries / semaphores, capped at 112 MiB:
    #   v7x  (64 MiB physical)  -> ~52 MiB
    #   v5e/v6e (128 MiB)       -> 112 MiB
    return int(min(cap - 12 * 1024 * 1024, 112 * 1024 * 1024))


# ------------------------------ host-side wrapper -----------------------------

def encoder_forward(x, layer_params, final_gamma, final_beta, h,
                    seqs_per_block=None, target_rows=512):
    """layer_params: list (len == num_layers) of per-layer parameter dicts.
    Per-layer weights are supported (nn.TransformerEncoder deep-copies the layer)."""
    B, S, D = x.shape
    num_layers = len(layer_params)
    dk = D // h
    scale = 1.0 / math.sqrt(dk)
    bf16, f32 = jnp.bfloat16, jnp.float32

    if seqs_per_block is None:
        seqs_per_block = _pick_seqs_per_block(B, S, target_rows)
    assert B % seqs_per_block == 0
    rows_per_block = seqs_per_block * S
    if rows_per_block % 8 != 0 and seqs_per_block != B:
        seqs_per_block, rows_per_block = B, B * S      # full-extent block is always legal
    n_batch_tiles = B // seqs_per_block

    def prep(p):
        # MXU operands in bf16 (halves weight DMA/VMEM); biases & LN params in f32.
        # The 1/sqrt(dk) attention scale is folded into the Q projection here (free).
        wqkv = jnp.concatenate([p["wq"] * scale, p["wk"], p["wv"]], axis=1).astype(bf16)
        bqkv = jnp.concatenate([p["bq"] * scale, p["bk"], p["bv"]], axis=1).astype(f32)
        return (wqkv, bqkv,
                p["wo"].astype(bf16), p["bo"].astype(f32),
                p["w1"].astype(bf16), p["b1"].astype(f32),
                p["w2"].astype(bf16), p["b2"].astype(f32),
                p["g1"].astype(f32), p["be1"].astype(f32),
                p["g2"].astype(f32), p["be2"].astype(f32))

    # Stack each parameter along a leading num_layers axis; the layer grid axis
    # indexes it, so layer l+1's weights prefetch behind layer l's compute.
    stacked = [jnp.stack(ts, axis=0) for ts in zip(*(prep(p) for p in layer_params))]
    gf = final_gamma.astype(f32)
    bf = final_beta.astype(f32)

    x2d = x.astype(f32).reshape(B * S, D)              # fold batch into the sublane axis

    def act_map(bt, l):                                # constant across layers -> resident
        return (bt, 0)

    def layer_spec(arr):
        nd = arr.ndim
        return pl.BlockSpec((1,) + arr.shape[1:],
                            lambda bt, l, _nd=nd: (l,) + (0,) * (_nd - 1))

    def const_spec(arr):
        nd = arr.ndim
        return pl.BlockSpec(arr.shape, lambda bt, l, _nd=nd: (0,) * _nd)

    in_specs = [pl.BlockSpec((rows_per_block, D), act_map)]
    in_specs += [layer_spec(a) for a in stacked]
    in_specs += [const_spec(gf), const_spec(bf)]

    out = pl.pallas_call(
        functools.partial(encoder_stack_kernel, h=h, n_seq=seqs_per_block,
                          seq_len=S, d_model=D),
        out_shape=jax.ShapeDtypeStruct((B * S, D), jnp.float32),
        grid_spec=pltpu.PrefetchScalarGridSpec(
            num_scalar_prefetch=0,
            grid=(n_batch_tiles, num_layers),
            in_specs=in_specs,
            out_specs=pl.BlockSpec((rows_per_block, D), act_map),
        ),
        input_output_aliases={0: 0},                   # x2d and the output share HBM
        compiler_params=pltpu.CompilerParams(
            dimension_semantics=("parallel", "arbitrary"),
            vmem_limit_bytes=_pick_vmem_limit_bytes(),
        ),
    )(x2d, *stacked, gf, bf)
    return out.reshape(B, S, D).astype(x.dtype)


# ----------------------------- pure-JAX reference ------------------------------

def _ref_layer(x, p, h):
    B, S, D = x.shape
    dk = D // h
    q = x @ p["wq"] + p["bq"]
    k = x @ p["wk"] + p["bk"]
    v = x @ p["wv"] + p["bv"]
    qh = q.reshape(B, S, h, dk).transpose(0, 2, 1, 3)
    kh = k.reshape(B, S, h, dk).transpose(0, 2, 1, 3)
    vh = v.reshape(B, S, h, dk).transpose(0, 2, 1, 3)
    scores = jnp.einsum("bhqd,bhkd->bhqk", qh, kh) / (dk ** 0.5)
    probs = jax.nn.softmax(scores, axis=-1)
    attn = jnp.einsum("bhqk,bhkd->bhqd", probs, vh).transpose(0, 2, 1, 3).reshape(B, S, D)
    attn = attn @ p["wo"] + p["bo"]

    def ln(z, g, b):
        m = jnp.mean(z, -1, keepdims=True)
        var = jnp.mean((z - m) ** 2, -1, keepdims=True)
        return (z - m) / jnp.sqrt(var + 1e-5) * g + b

    x1 = ln(x + attn, p["g1"], p["be1"])
    ff = jnp.maximum(x1 @ p["w1"] + p["b1"], 0.0) @ p["w2"] + p["b2"]
    return ln(x1 + ff, p["g2"], p["be2"])


def _ref_encoder(x, layer_params, gF, bF, h):
    out = x
    for p in layer_params:
        out = _ref_layer(out, p, h)
    m = jnp.mean(out, -1, keepdims=True)
    var = jnp.mean((out - m) ** 2, -1, keepdims=True)
    return (out - m) / jnp.sqrt(var + 1e-5) * gF + bF


# ------------------------------------ main -------------------------------------

if __name__ == "__main__":
    B, S, D, H, D_FF, NUM_LAYERS = 2, 8, 128, 4, 256, 2   # d_model=128 -> lane-dense

    key = jax.random.PRNGKey(0)

    def w(k, shape):
        return (0.02 * jax.random.normal(k, shape)).astype(jnp.float32)

    def make_layer(k):
        ks = jax.random.split(k, 6)
        # Biases / LN params kept as (1, D)/(1, d_ff) 2-D slabs for TPU-friendly layout.
        return {
            "wq": w(ks[0], (D, D)),    "bq": jnp.zeros((1, D), jnp.float32),
            "wk": w(ks[1], (D, D)),    "bk": jnp.zeros((1, D), jnp.float32),
            "wv": w(ks[2], (D, D)),    "bv": jnp.zeros((1, D), jnp.float32),
            "wo": w(ks[3], (D, D)),    "bo": jnp.zeros((1, D), jnp.float32),
            "w1": w(ks[4], (D, D_FF)), "b1": jnp.zeros((1, D_FF), jnp.float32),
            "w2": w(ks[5], (D_FF, D)), "b2": jnp.zeros((1, D), jnp.float32),
            "g1": jnp.ones((1, D), jnp.float32), "be1": jnp.zeros((1, D), jnp.float32),
            "g2": jnp.ones((1, D), jnp.float32), "be2": jnp.zeros((1, D), jnp.float32),
        }

    lkeys = jax.random.split(key, NUM_LAYERS + 1)
    # Distinct per-layer parameters (superset of the deepcopy-at-init case).
    layer_params = [make_layer(lkeys[i]) for i in range(NUM_LAYERS)]
    final_gamma = jnp.ones((1, D), jnp.float32)
    final_beta = jnp.zeros((1, D), jnp.float32)

    x = jax.random.normal(lkeys[-1], (B, S, D), jnp.float32)

    out = encoder_forward(x, layer_params, final_gamma, final_beta, H)
    out = jax.block_until_ready(out)

    ref = _ref_encoder(x, layer_params, final_gamma, final_beta, H)
    assert out.shape == (B, S, D)
    # bf16 MXU inputs (f32 accumulation) + approx reciprocal vs f32 reference.
    assert jnp.allclose(out, ref, atol=3e-2, rtol=3e-2), "mismatch vs JAX reference"

    print("KERNEL_OK")
</pallas_src>

<mosaic_0001>
module attributes {stable_mosaic.version = 11 : i64} {
  func.func @encoder_stack_kernel(%arg0: i32, %arg1: i32, %arg2: memref<8x128xf32, #tpu.memory_space<vmem>>, %arg3: memref<1x128x384xbf16, #tpu.memory_space<vmem>>, %arg4: memref<1x1x384xf32, #tpu.memory_space<vmem>>, %arg5: memref<1x128x128xbf16, #tpu.memory_space<vmem>>, %arg6: memref<1x1x128xf32, #tpu.memory_space<vmem>>, %arg7: memref<1x128x256xbf16, #tpu.memory_space<vmem>>, %arg8: memref<1x1x256xf32, #tpu.memory_space<vmem>>, %arg9: memref<1x256x128xbf16, #tpu.memory_space<vmem>>, %arg10: memref<1x1x128xf32, #tpu.memory_space<vmem>>, %arg11: memref<1x1x128xf32, #tpu.memory_space<vmem>>, %arg12: memref<1x1x128xf32, #tpu.memory_space<vmem>>, %arg13: memref<1x1x128xf32, #tpu.memory_space<vmem>>, %arg14: memref<1x1x128xf32, #tpu.memory_space<vmem>>, %arg15: memref<1x128xf32, #tpu.memory_space<vmem>>, %arg16: memref<1x128xf32, #tpu.memory_space<vmem>>, %arg17: memref<8x128xf32, #tpu.memory_space<vmem>>) attributes {dimension_semantics = [#tpu.dimension_semantics<parallel>, #tpu.dimension_semantics<arbitrary>], iteration_bounds = array<i64: 2, 2>, scalar_prefetch = 0 : i64, scratch_operands = 0 : i64, tpu.core_type = #tpu.core_type<tc>, window_params = [{transform_indices = @transform_0, window_bounds = array<i64: 8, 128>}, {transform_indices = @transform_1, window_bounds = array<i64: 1, 128, 384>}, {transform_indices = @transform_2, window_bounds = array<i64: 1, 1, 384>}, {transform_indices = @transform_3, window_bounds = array<i64: 1, 128, 128>}, {transform_indices = @transform_4, window_bounds = array<i64: 1, 1, 128>}, {transform_indices = @transform_5, window_bounds = array<i64: 1, 128, 256>}, {transform_indices = @transform_6, window_bounds = array<i64: 1, 1, 256>}, {transform_indices = @transform_7, window_bounds = array<i64: 1, 256, 128>}, {transform_indices = @transform_8, window_bounds = array<i64: 1, 1, 128>}, {transform_indices = @transform_9, window_bounds = array<i64: 1, 1, 128>}, {transform_indices = @transform_10, window_bounds = array<i64: 1, 1, 128>}, {transform_indices = @transform_11, window_bounds = array<i64: 1, 1, 128>}, {transform_indices = @transform_12, window_bounds = array<i64: 1, 1, 128>}, {pipeline_mode = #tpu.pipeline_mode<synchronous>, transform_indices = @transform_13, window_bounds = array<i64: 1, 128>}, {pipeline_mode = #tpu.pipeline_mode<synchronous>, transform_indices = @transform_14, window_bounds = array<i64: 1, 128>}, {transform_indices = @transform_15, window_bounds = array<i64: 8, 128>}]} {
    %c0_i32 = arith.constant 0 : i32
    %0 = arith.cmpi eq, %arg1, %c0_i32 : i32
    %1 = arith.extui %0 : i1 to i32
    %c0_i32_0 = arith.constant 0 : i32
    %2 = arith.cmpi ne, %1, %c0_i32_0 : i32
    scf.if %2 {
      %c0_71 = arith.constant 0 : index
      %c0_72 = arith.constant 0 : index
      %174 = vector.load %arg2[%c0_71, %c0_72] : memref<8x128xf32, #tpu.memory_space<vmem>>, vector<8x128xf32>
      %c0_73 = arith.constant 0 : index
      %c0_74 = arith.constant 0 : index
      %175 = vector.load %arg17[%c0_73, %c0_74] : memref<8x128xf32, #tpu.memory_space<vmem>>, vector<8x128xf32>
      tpu.vector_store %arg17[%c0_73, %c0_74], %174 {strides = array<i32>} : memref<8x128xf32, #tpu.memory_space<vmem>>, vector<8x128xf32>,
    } else {
    }
    %c0 = arith.constant 0 : index
    %c0_1 = arith.constant 0 : index
    %3 = vector.load %arg17[%c0, %c0_1] : memref<8x128xf32, #tpu.memory_space<vmem>>, vector<8x128xf32>
    %4 = arith.truncf %3 : vector<8x128xf32> to vector<8x128xbf16>
    %c0_2 = arith.constant 0 : index
    %c0_3 = arith.constant 0 : index
    %c0_4 = arith.constant 0 : index
    %5 = vector.load %arg3[%c0_2, %c0_3, %c0_4] : memref<1x128x384xbf16, #tpu.memory_space<vmem>>, vector<1x128x384xbf16>
    %6 = vector.shape_cast %5 : vector<1x128x384xbf16> to vector<128x384xbf16>
    %cst = arith.constant dense<0.000000e+00> : vector<8x384xf32>
    %7 = tpu.matmul %4, %6, %cst {dimension_numbers = #tpu.dot_dimension_numbers<[1], [0], [0], [1], [0, 0, 1, 1], [], []>} : vector<8x128xbf16>, vector<128x384xbf16>, vector<8x384xf32> -> vector<8x384xf32>
    %c0_5 = arith.constant 0 : index
    %c0_6 = arith.constant 0 : index
    %c0_7 = arith.constant 0 : index
    %8 = vector.load %arg4[%c0_5, %c0_6, %c0_7] : memref<1x1x384xf32, #tpu.memory_space<vmem>>, vector<1x1x384xf32>
    %9 = vector.shape_cast %8 : vector<1x1x384xf32> to vector<1x384xf32>
    %10 = vector.broadcast %9 : vector<1x384xf32> to vector<8x384xf32>
    %11 = arith.addf %7, %10 : vector<8x384xf32>
    %12 = arith.truncf %11 : vector<8x384xf32> to vector<8x384xbf16>
    %13 = vector.extract_strided_slice %12 {offsets = [0, 0], sizes = [8, 128], strides = [1, 1]} : vector<8x384xbf16> to vector<8x128xbf16>
    %14 = vector.shape_cast %13 : vector<8x128xbf16> to vector<1x8x128xbf16>
    %15 = vector.extract_strided_slice %12 {offsets = [0, 128], sizes = [8, 128], strides = [1, 1]} : vector<8x384xbf16> to vector<8x128xbf16>
    %16 = vector.shape_cast %15 : vector<8x128xbf16> to vector<1x8x128xbf16>
    %17 = vector.extract_strided_slice %12 {offsets = [0, 256], sizes = [8, 128], strides = [1, 1]} : vector<8x384xbf16> to vector<8x128xbf16>
    %18 = vector.shape_cast %17 : vector<8x128xbf16> to vector<1x8x128xbf16>
    %19 = vector.extract_strided_slice %14 {offsets = [0, 0, 0], sizes = [1, 8, 32], strides = [1, 1, 1]} : vector<1x8x128xbf16> to vector<1x8x32xbf16>
    %20 = vector.extract_strided_slice %16 {offsets = [0, 0, 0], sizes = [1, 8, 32], strides = [1, 1, 1]} : vector<1x8x128xbf16> to vector<1x8x32xbf16>
    %21 = vector.extract_strided_slice %18 {offsets = [0, 0, 0], sizes = [1, 8, 32], strides = [1, 1, 1]} : vector<1x8x128xbf16> to vector<1x8x32xbf16>
    %cst_8 = arith.constant dense<0.000000e+00> : vector<1x8x8xf32>
    %22 = tpu.matmul %19, %20, %cst_8 {dimension_numbers = #tpu.dot_dimension_numbers<[2], [2], [1], [1], [0, 0, 0, 1, 1, 1], [0], [0]>} : vector<1x8x32xbf16>, vector<1x8x32xbf16>, vector<1x8x8xf32> -> vector<1x8x8xf32>
    %cst_9 = arith.constant dense<0xFF800000> : vector<1x8xf32>
    %23 = vector.multi_reduction <maximumf>, %22, %cst_9 [2] : vector<1x8x8xf32> to vector<1x8xf32>
    %24 = vector.shape_cast %23 : vector<1x8xf32> to vector<1x8x1xf32>
    %25 = vector.broadcast %24 : vector<1x8x1xf32> to vector<1x8x8xf32>
    %26 = arith.subf %22, %25 : vector<1x8x8xf32>
    %27 = math.exp %26 : vector<1x8x8xf32>
    %cst_10 = arith.constant dense<0.000000e+00> : vector<1x8xf32>
    %28 = vector.multi_reduction <add>, %27, %cst_10 [2] : vector<1x8x8xf32> to vector<1x8xf32>
    %29 = vector.shape_cast %28 : vector<1x8xf32> to vector<1x8x1xf32>
    %30 = tpu.reciprocal %29 {approx = true} : vector<1x8x1xf32> -> vector<1x8x1xf32>
    %31 = vector.broadcast %30 : vector<1x8x1xf32> to vector<1x8x8xf32>
    %32 = arith.mulf %27, %31 : vector<1x8x8xf32>
    %33 = arith.truncf %32 : vector<1x8x8xf32> to vector<1x8x8xbf16>
    %cst_11 = arith.constant dense<0.000000e+00> : vector<1x8x32xf32>
    %34 = tpu.matmul %33, %21, %cst_11 {dimension_numbers = #tpu.dot_dimension_numbers<[2], [1], [1], [2], [0, 0, 0, 1, 1, 2], [0], [0]>} : vector<1x8x8xbf16>, vector<1x8x32xbf16>, vector<1x8x32xf32> -> vector<1x8x32xf32>
    %35 = arith.truncf %34 : vector<1x8x32xf32> to vector<1x8x32xbf16>
    %36 = vector.extract_strided_slice %14 {offsets = [0, 0, 32], sizes = [1, 8, 32], strides = [1, 1, 1]} : vector<1x8x128xbf16> to vector<1x8x32xbf16>
    %37 = vector.extract_strided_slice %16 {offsets = [0, 0, 32], sizes = [1, 8, 32], strides = [1, 1, 1]} : vector<1x8x128xbf16> to vector<1x8x32xbf16>
    %38 = vector.extract_strided_slice %18 {offsets = [0, 0, 32], sizes = [1, 8, 32], strides = [1, 1, 1]} : vector<1x8x128xbf16> to vector<1x8x32xbf16>
    %cst_12 = arith.constant dense<0.000000e+00> : vector<1x8x8xf32>
    %39 = tpu.matmul %36, %37, %cst_12 {dimension_numbers = #tpu.dot_dimension_numbers<[2], [2], [1], [1], [0, 0, 0, 1, 1, 1], [0], [0]>} : vector<1x8x32xbf16>, vector<1x8x32xbf16>, vector<1x8x8xf32> -> vector<1x8x8xf32>
    %cst_13 = arith.constant dense<0xFF800000> : vector<1x8xf32>
    %40 = vector.multi_reduction <maximumf>, %39, %cst_13 [2] : vector<1x8x8xf32> to vector<1x8xf32>
    %41 = vector.shape_cast %40 : vector<1x8xf32> to vector<1x8x1xf32>
    %42 = vector.broadcast %41 : vector<1x8x1xf32> to vector<1x8x8xf32>
    %43 = arith.subf %39, %42 : vector<1x8x8xf32>
    %44 = math.exp %43 : vector<1x8x8xf32>
    %cst_14 = arith.constant dense<0.000000e+00> : vector<1x8xf32>
    %45 = vector.multi_reduction <add>, %44, %cst_14 [2] : vector<1x8x8xf32> to vector<1x8xf32>
    %46 = vector.shape_cast %45 : vector<1x8xf32> to vector<1x8x1xf32>
    %47 = tpu.reciprocal %46 {approx = true} : vector<1x8x1xf32> -> vector<1x8x1xf32>
    %48 = vector.broadcast %47 : vector<1x8x1xf32> to vector<1x8x8xf32>
    %49 = arith.mulf %44, %48 : vector<1x8x8xf32>
    %50 = arith.truncf %49 : vector<1x8x8xf32> to vector<1x8x8xbf16>
    %cst_15 = arith.constant dense<0.000000e+00> : vector<1x8x32xf32>
    %51 = tpu.matmul %50, %38, %cst_15 {dimension_numbers = #tpu.dot_dimension_numbers<[2], [1], [1], [2], [0, 0, 0, 1, 1, 2], [0], [0]>} : vector<1x8x8xbf16>, vector<1x8x32xbf16>, vector<1x8x32xf32> -> vector<1x8x32xf32>
    %52 = arith.truncf %51 : vector<1x8x32xf32> to vector<1x8x32xbf16>
    %53 = vector.extract_strided_slice %14 {offsets = [0, 0, 64], sizes = [1, 8, 32], strides = [1, 1, 1]} : vector<1x8x128xbf16> to vector<1x8x32xbf16>
    %54 = vector.extract_strided_slice %16 {offsets = [0, 0, 64], sizes = [1, 8, 32], strides = [1, 1, 1]} : vector<1x8x128xbf16> to vector<1x8x32xbf16>
    %55 = vector.extract_strided_slice %18 {offsets = [0, 0, 64], sizes = [1, 8, 32], strides = [1, 1, 1]} : vector<1x8x128xbf16> to vector<1x8x32xbf16>
    %cst_16 = arith.constant dense<0.000000e+00> : vector<1x8x8xf32>
    %56 = tpu.matmul %53, %54, %cst_16 {dimension_numbers = #tpu.dot_dimension_numbers<[2], [2], [1], [1], [0, 0, 0, 1, 1, 1], [0], [0]>} : vector<1x8x32xbf16>, vector<1x8x32xbf16>, vector<1x8x8xf32> -> vector<1x8x8xf32>
    %cst_17 = arith.constant dense<0xFF800000> : vector<1x8xf32>
    %57 = vector.multi_reduction <maximumf>, %56, %cst_17 [2] : vector<1x8x8xf32> to vector<1x8xf32>
    %58 = vector.shape_cast %57 : vector<1x8xf32> to vector<1x8x1xf32>
    %59 = vector.broadcast %58 : vector<1x8x1xf32> to vector<1x8x8xf32>
    %60 = arith.subf %56, %59 : vector<1x8x8xf32>
    %61 = math.exp %60 : vector<1x8x8xf32>
    %cst_18 = arith.constant dense<0.000000e+00> : vector<1x8xf32>
    %62 = vector.multi_reduction <add>, %61, %cst_18 [2] : vector<1x8x8xf32> to vector<1x8xf32>
    %63 = vector.shape_cast %62 : vector<1x8xf32> to vector<1x8x1xf32>
    %64 = tpu.reciprocal %63 {approx = true} : vector<1x8x1xf32> -> vector<1x8x1xf32>
    %65 = vector.broadcast %64 : vector<1x8x1xf32> to vector<1x8x8xf32>
    %66 = arith.mulf %61, %65 : vector<1x8x8xf32>
    %67 = arith.truncf %66 : vector<1x8x8xf32> to vector<1x8x8xbf16>
    %cst_19 = arith.constant dense<0.000000e+00> : vector<1x8x32xf32>
    %68 = tpu.matmul %67, %55, %cst_19 {dimension_numbers = #tpu.dot_dimension_numbers<[2], [1], [1], [2], [0, 0, 0, 1, 1, 2], [0], [0]>} : vector<1x8x8xbf16>, vector<1x8x32xbf16>, vector<1x8x32xf32> -> vector<1x8x32xf32>
    %69 = arith.truncf %68 : vector<1x8x32xf32> to vector<1x8x32xbf16>
    %70 = vector.extract_strided_slice %14 {offsets = [0, 0, 96], sizes = [1, 8, 32], strides = [1, 1, 1]} : vector<1x8x128xbf16> to vector<1x8x32xbf16>
    %71 = vector.extract_strided_slice %16 {offsets = [0, 0, 96], sizes = [1, 8, 32], strides = [1, 1, 1]} : vector<1x8x128xbf16> to vector<1x8x32xbf16>
    %72 = vector.extract_strided_slice %18 {offsets = [0, 0, 96], sizes = [1, 8, 32], strides = [1, 1, 1]} : vector<1x8x128xbf16> to vector<1x8x32xbf16>
    %cst_20 = arith.constant dense<0.000000e+00> : vector<1x8x8xf32>
    %73 = tpu.matmul %70, %71, %cst_20 {dimension_numbers = #tpu.dot_dimension_numbers<[2], [2], [1], [1], [0, 0, 0, 1, 1, 1], [0], [0]>} : vector<1x8x32xbf16>, vector<1x8x32xbf16>, vector<1x8x8xf32> -> vector<1x8x8xf32>
    %cst_21 = arith.constant dense<0xFF800000> : vector<1x8xf32>
    %74 = vector.multi_reduction <maximumf>, %73, %cst_21 [2] : vector<1x8x8xf32> to vector<1x8xf32>
    %75 = vector.shape_cast %74 : vector<1x8xf32> to vector<1x8x1xf32>
    %76 = vector.broadcast %75 : vector<1x8x1xf32> to vector<1x8x8xf32>
    %77 = arith.subf %73, %76 : vector<1x8x8xf32>
    %78 = math.exp %77 : vector<1x8x8xf32>
    %cst_22 = arith.constant dense<0.000000e+00> : vector<1x8xf32>
    %79 = vector.multi_reduction <add>, %78, %cst_22 [2] : vector<1x8x8xf32> to vector<1x8xf32>
    %80 = vector.shape_cast %79 : vector<1x8xf32> to vector<1x8x1xf32>
    %81 = tpu.reciprocal %80 {approx = true} : vector<1x8x1xf32> -> vector<1x8x1xf32>
    %82 = vector.broadcast %81 : vector<1x8x1xf32> to vector<1x8x8xf32>
    %83 = arith.mulf %78, %82 : vector<1x8x8xf32>
    %84 = arith.truncf %83 : vector<1x8x8xf32> to vector<1x8x8xbf16>
    %cst_23 = arith.constant dense<0.000000e+00> : vector<1x8x32xf32>
    %85 = tpu.matmul %84, %72, %cst_23 {dimension_numbers = #tpu.dot_dimension_numbers<[2], [1], [1], [2], [0, 0, 0, 1, 1, 2], [0], [0]>} : vector<1x8x8xbf16>, vector<1x8x32xbf16>, vector<1x8x32xf32> -> vector<1x8x32xf32>
    %86 = arith.truncf %85 : vector<1x8x32xf32> to vector<1x8x32xbf16>
    %87 = tpu.concatenate %35, %52, %69, %86 in 2 : vector<1x8x32xbf16>, vector<1x8x32xbf16>, vector<1x8x32xbf16>, vector<1x8x32xbf16> -> vector<1x8x128xbf16>
    %88 = vector.shape_cast %87 : vector<1x8x128xbf16> to vector<8x128xbf16>
    %c0_24 = arith.constant 0 : index
    %c0_25 = arith.constant 0 : index
    %c0_26 = arith.constant 0 : index
    %89 = vector.load %arg5[%c0_24, %c0_25, %c0_26] : memref<1x128x128xbf16, #tpu.memory_space<vmem>>, vector<1x128x128xbf16>
    %90 = vector.shape_cast %89 : vector<1x128x128xbf16> to vector<128x128xbf16>
    %cst_27 = arith.constant dense<0.000000e+00> : vector<8x128xf32>
    %91 = tpu.matmul %88, %90, %cst_27 {dimension_numbers = #tpu.dot_dimension_numbers<[1], [0], [0], [1], [0, 0, 1, 1], [], []>} : vector<8x128xbf16>, vector<128x128xbf16>, vector<8x128xf32> -> vector<8x128xf32>
    %c0_28 = arith.constant 0 : index
    %c0_29 = arith.constant 0 : index
    %c0_30 = arith.constant 0 : index
    %92 = vector.load %arg6[%c0_28, %c0_29, %c0_30] : memref<1x1x128xf32, #tpu.memory_space<vmem>>, vector<1x1x128xf32>
    %93 = vector.shape_cast %92 : vector<1x1x128xf32> to vector<1x128xf32>
    %94 = vector.broadcast %93 : vector<1x128xf32> to vector<8x128xf32>
    %95 = arith.addf %91, %94 : vector<8x128xf32>
    %96 = arith.addf %3, %95 : vector<8x128xf32>
    %c0_31 = arith.constant 0 : index
    %c0_32 = arith.constant 0 : index
    %c0_33 = arith.constant 0 : index
    %97 = vector.load %arg11[%c0_31, %c0_32, %c0_33] : memref<1x1x128xf32, #tpu.memory_space<vmem>>, vector<1x1x128xf32>
    %98 = vector.shape_cast %97 : vector<1x1x128xf32> to vector<1x128xf32>
    %c0_34 = arith.constant 0 : index
    %c0_35 = arith.constant 0 : index
    %c0_36 = arith.constant 0 : index
    %99 = vector.load %arg12[%c0_34, %c0_35, %c0_36] : memref<1x1x128xf32, #tpu.memory_space<vmem>>, vector<1x1x128xf32>
    %100 = vector.shape_cast %99 : vector<1x1x128xf32> to vector<1x128xf32>
    %cst_37 = arith.constant dense<0.000000e+00> : vector<8xf32>
    %101 = vector.multi_reduction <add>, %96, %cst_37 [1] : vector<8x128xf32> to vector<8xf32>
    %102 = vector.shape_cast %101 : vector<8xf32> to vector<8x1xf32>
    %cst_38 = arith.constant 1.280000e+02 : f32
    %103 = vector.broadcast %cst_38 : f32 to vector<8x1xf32>
    %104 = arith.divf %102, %103 : vector<8x1xf32>
    %105 = vector.broadcast %104 : vector<8x1xf32> to vector<8x128xf32>
    %106 = arith.subf %96, %105 : vector<8x128xf32>
    %107 = arith.mulf %106, %106 : vector<8x128xf32>
    %cst_39 = arith.constant dense<0.000000e+00> : vector<8xf32>
    %108 = vector.multi_reduction <add>, %107, %cst_39 [1] : vector<8x128xf32> to vector<8xf32>
    %109 = vector.shape_cast %108 : vector<8xf32> to vector<8x1xf32>
    %cst_40 = arith.constant 1.280000e+02 : f32
    %110 = vector.broadcast %cst_40 : f32 to vector<8x1xf32>
    %111 = arith.divf %109, %110 : vector<8x1xf32>
    %112 = vector.broadcast %104 : vector<8x1xf32> to vector<8x128xf32>
    %113 = arith.subf %96, %112 : vector<8x128xf32>
    %cst_41 = arith.constant 9.99999974E-6 : f32
    %114 = vector.broadcast %cst_41 : f32 to vector<8x1xf32>
    %115 = arith.addf %111, %114 : vector<8x1xf32>
    %116 = math.rsqrt %115 : vector<8x1xf32>
    %117 = vector.broadcast %116 : vector<8x1xf32> to vector<8x128xf32>
    %118 = arith.mulf %113, %117 : vector<8x128xf32>
    %119 = vector.broadcast %98 : vector<1x128xf32> to vector<8x128xf32>
    %120 = arith.mulf %118, %119 : vector<8x128xf32>
    %121 = vector.broadcast %100 : vector<1x128xf32> to vector<8x128xf32>
    %122 = arith.addf %120, %121 : vector<8x128xf32>
    %123 = arith.truncf %122 : vector<8x128xf32> to vector<8x128xbf16>
    %c0_42 = arith.constant 0 : index
    %c0_43 = arith.constant 0 : index
    %c0_44 = arith.constant 0 : index
    %124 = vector.load %arg7[%c0_42, %c0_43, %c0_44] : memref<1x128x256xbf16, #tpu.memory_space<vmem>>, vector<1x128x256xbf16>
    %125 = vector.shape_cast %124 : vector<1x128x256xbf16> to vector<128x256xbf16>
    %cst_45 = arith.constant dense<0.000000e+00> : vector<8x256xf32>
    %126 = tpu.matmul %123, %125, %cst_45 {dimension_numbers = #tpu.dot_dimension_numbers<[1], [0], [0], [1], [0, 0, 1, 1], [], []>} : vector<8x128xbf16>, vector<128x256xbf16>, vector<8x256xf32> -> vector<8x256xf32>
    %c0_46 = arith.constant 0 : index
    %c0_47 = arith.constant 0 : index
    %c0_48 = arith.constant 0 : index
    %127 = vector.load %arg8[%c0_46, %c0_47, %c0_48] : memref<1x1x256xf32, #tpu.memory_space<vmem>>, vector<1x1x256xf32>
    %128 = vector.shape_cast %127 : vector<1x1x256xf32> to vector<1x256xf32>
    %129 = vector.broadcast %128 : vector<1x256xf32> to vector<8x256xf32>
    %130 = arith.addf %126, %129 : vector<8x256xf32>
    %cst_49 = arith.constant 0.000000e+00 : f32
    %131 = vector.broadcast %cst_49 : f32 to vector<8x256xf32>
    %132 = arith.maximumf %130, %131 : vector<8x256xf32>
    %133 = arith.truncf %132 : vector<8x256xf32> to vector<8x256xbf16>
    %c0_50 = arith.constant 0 : index
    %c0_51 = arith.constant 0 : index
    %c0_52 = arith.constant 0 : index
    %134 = vector.load %arg9[%c0_50, %c0_51, %c0_52] : memref<1x256x128xbf16, #tpu.memory_space<vmem>>, vector<1x256x128xbf16>
    %135 = vector.shape_cast %134 : vector<1x256x128xbf16> to vector<256x128xbf16>
    %cst_53 = arith.constant dense<0.000000e+00> : vector<8x128xf32>
    %136 = tpu.matmul %133, %135, %cst_53 {dimension_numbers = #tpu.dot_dimension_numbers<[1], [0], [0], [1], [0, 0, 1, 1], [], []>} : vector<8x256xbf16>, vector<256x128xbf16>, vector<8x128xf32> -> vector<8x128xf32>
    %c0_54 = arith.constant 0 : index
    %c0_55 = arith.constant 0 : index
    %c0_56 = arith.constant 0 : index
    %137 = vector.load %arg10[%c0_54, %c0_55, %c0_56] : memref<1x1x128xf32, #tpu.memory_space<vmem>>, vector<1x1x128xf32>
    %138 = vector.shape_cast %137 : vector<1x1x128xf32> to vector<1x128xf32>
    %139 = vector.broadcast %138 : vector<1x128xf32> to vector<8x128xf32>
    %140 = arith.addf %136, %139 : vector<8x128xf32>
    %141 = arith.addf %122, %140 : vector<8x128xf32>
    %c0_57 = arith.constant 0 : index
    %c0_58 = arith.constant 0 : index
    %c0_59 = arith.constant 0 : index
    %142 = vector.load %arg13[%c0_57, %c0_58, %c0_59] : memref<1x1x128xf32, #tpu.memory_space<vmem>>, vector<1x1x128xf32>
    %143 = vector.shape_cast %142 : vector<1x1x128xf32> to vector<1x128xf32>
    %c0_60 = arith.constant 0 : index
    %c0_61 = arith.constant 0 : index
    %c0_62 = arith.constant 0 : index
    %144 = vector.load %arg14[%c0_60, %c0_61, %c0_62] : memref<1x1x128xf32, #tpu.memory_space<vmem>>, vector<1x1x128xf32>
    %145 = vector.shape_cast %144 : vector<1x1x128xf32> to vector<1x128xf32>
    %cst_63 = arith.constant dense<0.000000e+00> : vector<8xf32>
    %146 = vector.multi_reduction <add>, %141, %cst_63 [1] : vector<8x128xf32> to vector<8xf32>
    %147 = vector.shape_cast %146 : vector<8xf32> to vector<8x1xf32>
    %cst_64 = arith.constant 1.280000e+02 : f32
    %148 = vector.broadcast %cst_64 : f32 to vector<8x1xf32>
    %149 = arith.divf %147, %148 : vector<8x1xf32>
    %150 = vector.broadcast %149 : vector<8x1xf32> to vector<8x128xf32>
    %151 = arith.subf %141, %150 : vector<8x128xf32>
    %152 = arith.mulf %151, %151 : vector<8x128xf32>
    %cst_65 = arith.constant dense<0.000000e+00> : vector<8xf32>
    %153 = vector.multi_reduction <add>, %152, %cst_65 [1] : vector<8x128xf32> to vector<8xf32>
    %154 = vector.shape_cast %153 : vector<8xf32> to vector<8x1xf32>
    %cst_66 = arith.constant 1.280000e+02 : f32
    %155 = vector.broadcast %cst_66 : f32 to vector<8x1xf32>
    %156 = arith.divf %154, %155 : vector<8x1xf32>
    %157 = vector.broadcast %149 : vector<8x1xf32> to vector<8x128xf32>
    %158 = arith.subf %141, %157 : vector<8x128xf32>
    %cst_67 = arith.constant 9.99999974E-6 : f32
    %159 = vector.broadcast %cst_67 : f32 to vector<8x1xf32>
    %160 = arith.addf %156, %159 : vector<8x1xf32>
    %161 = math.rsqrt %160 : vector<8x1xf32>
    %162 = vector.broadcast %161 : vector<8x1xf32> to vector<8x128xf32>
    %163 = arith.mulf %158, %162 : vector<8x128xf32>
    %164 = vector.broadcast %143 : vector<1x128xf32> to vector<8x128xf32>
    %165 = arith.mulf %163, %164 : vector<8x128xf32>
    %166 = vector.broadcast %145 : vector<1x128xf32> to vector<8x128xf32>
    %167 = arith.addf %165, %166 : vector<8x128xf32>
    %c1_i32 = arith.constant 1 : i32
    %168 = arith.cmpi slt, %arg1, %c1_i32 : i32
    %169 = arith.extui %168 : i1 to i32
    %c0_i32_68 = arith.constant 0 : i32
    %170 = arith.cmpi ne, %169, %c0_i32_68 : i32
    scf.if %170 {
      %c0_71 = arith.constant 0 : index
      %c0_72 = arith.constant 0 : index
      %174 = vector.load %arg17[%c0_71, %c0_72] : memref<8x128xf32, #tpu.memory_space<vmem>>, vector<8x128xf32>
      tpu.vector_store %arg17[%c0_71, %c0_72], %167 {strides = array<i32>} : memref<8x128xf32, #tpu.memory_space<vmem>>, vector<8x128xf32>,
    } else {
    }
    %c1_i32_69 = arith.constant 1 : i32
    %171 = arith.cmpi eq, %arg1, %c1_i32_69 : i32
    %172 = arith.extui %171 : i1 to i32
    %c0_i32_70 = arith.constant 0 : i32
    %173 = arith.cmpi ne, %172, %c0_i32_70 : i32
    scf.if %173 {
      %c0_71 = arith.constant 0 : index
      %c0_72 = arith.constant 0 : index
      %174 = vector.load %arg15[%c0_71, %c0_72] : memref<1x128xf32, #tpu.memory_space<vmem>>, vector<1x128xf32>
      %c0_73 = arith.constant 0 : index
      %c0_74 = arith.constant 0 : index
      %175 = vector.load %arg16[%c0_73, %c0_74] : memref<1x128xf32, #tpu.memory_space<vmem>>, vector<1x128xf32>
      %cst_75 = arith.constant dense<0.000000e+00> : vector<8xf32>
      %176 = vector.multi_reduction <add>, %167, %cst_75 [1] : vector<8x128xf32> to vector<8xf32>
      %177 = vector.shape_cast %176 : vector<8xf32> to vector<8x1xf32>
      %cst_76 = arith.constant 1.280000e+02 : f32
      %178 = vector.broadcast %cst_76 : f32 to vector<8x1xf32>
      %179 = arith.divf %177, %178 : vector<8x1xf32>
      %180 = vector.broadcast %179 : vector<8x1xf32> to vector<8x128xf32>
      %181 = arith.subf %167, %180 : vector<8x128xf32>
      %182 = arith.mulf %181, %181 : vector<8x128xf32>
      %cst_77 = arith.constant dense<0.000000e+00> : vector<8xf32>
      %183 = vector.multi_reduction <add>, %182, %cst_77 [1] : vector<8x128xf32> to vector<8xf32>
      %184 = vector.shape_cast %183 : vector<8xf32> to vector<8x1xf32>
      %cst_78 = arith.constant 1.280000e+02 : f32
      %185 = vector.broadcast %cst_78 : f32 to vector<8x1xf32>
      %186 = arith.divf %184, %185 : vector<8x1xf32>
      %187 = vector.broadcast %179 : vector<8x1xf32> to vector<8x128xf32>
      %188 = arith.subf %167, %187 : vector<8x128xf32>
      %cst_79 = arith.constant 9.99999974E-6 : f32
      %189 = vector.broadcast %cst_79 : f32 to vector<8x1xf32>
      %190 = arith.addf %186, %189 : vector<8x1xf32>
      %191 = math.rsqrt %190 : vector<8x1xf32>
      %192 = vector.broadcast %191 : vector<8x1xf32> to vector<8x128xf32>
      %193 = arith.mulf %188, %192 : vector<8x128xf32>
      %194 = vector.broadcast %174 : vector<1x128xf32> to vector<8x128xf32>
      %195 = arith.mulf %193, %194 : vector<8x128xf32>
      %196 = vector.broadcast %175 : vector<1x128xf32> to vector<8x128xf32>
      %197 = arith.addf %195, %196 : vector<8x128xf32>
      %c0_80 = arith.constant 0 : index
      %c0_81 = arith.constant 0 : index
      %198 = vector.load %arg17[%c0_80, %c0_81] : memref<8x128xf32, #tpu.memory_space<vmem>>, vector<8x128xf32>
      tpu.vector_store %arg17[%c0_80, %c0_81], %197 {strides = array<i32>} : memref<8x128xf32, #tpu.memory_space<vmem>>, vector<8x128xf32>,
    } else {
    }
    return
  }
  func.func @transform_0(%arg0: i32, %arg1: i32) -> (i32, i32) {
    %c0_i32 = arith.constant 0 : i32
    %c0_i32_0 = arith.constant 0 : i32
    return %arg0, %c0_i32 : i32, i32
  }
  func.func @transform_1(%arg0: i32, %arg1: i32) -> (i32, i32, i32) {
    %c0_i32 = arith.constant 0 : i32
    %c0_i32_0 = arith.constant 0 : i32
    %c0_i32_1 = arith.constant 0 : i32
    return %arg1, %c0_i32, %c0_i32_0 : i32, i32, i32
  }
  func.func @transform_2(%arg0: i32, %arg1: i32) -> (i32, i32, i32) {
    %c0_i32 = arith.constant 0 : i32
    %c0_i32_0 = arith.constant 0 : i32
    %c0_i32_1 = arith.constant 0 : i32
    return %arg1, %c0_i32, %c0_i32_0 : i32, i32, i32
  }
  func.func @transform_3(%arg0: i32, %arg1: i32) -> (i32, i32, i32) {
    %c0_i32 = arith.constant 0 : i32
    %c0_i32_0 = arith.constant 0 : i32
    %c0_i32_1 = arith.constant 0 : i32
    return %arg1, %c0_i32, %c0_i32_0 : i32, i32, i32
  }
  func.func @transform_4(%arg0: i32, %arg1: i32) -> (i32, i32, i32) {
    %c0_i32 = arith.constant 0 : i32
    %c0_i32_0 = arith.constant 0 : i32
    %c0_i32_1 = arith.constant 0 : i32
    return %arg1, %c0_i32, %c0_i32_0 : i32, i32, i32
  }
  func.func @transform_5(%arg0: i32, %arg1: i32) -> (i32, i32, i32) {
    %c0_i32 = arith.constant 0 : i32
    %c0_i32_0 = arith.constant 0 : i32
    %c0_i32_1 = arith.constant 0 : i32
    return %arg1, %c0_i32, %c0_i32_0 : i32, i32, i32
  }
  func.func @transform_6(%arg0: i32, %arg1: i32) -> (i32, i32, i32) {
    %c0_i32 = arith.constant 0 : i32
    %c0_i32_0 = arith.constant 0 : i32
    %c0_i32_1 = arith.constant 0 : i32
    return %arg1, %c0_i32, %c0_i32_0 : i32, i32, i32
  }
  func.func @transform_7(%arg0: i32, %arg1: i32) -> (i32, i32, i32) {
    %c0_i32 = arith.constant 0 : i32
    %c0_i32_0 = arith.constant 0 : i32
    %c0_i32_1 = arith.constant 0 : i32
    return %arg1, %c0_i32, %c0_i32_0 : i32, i32, i32
  }
  func.func @transform_8(%arg0: i32, %arg1: i32) -> (i32, i32, i32) {
    %c0_i32 = arith.constant 0 : i32
    %c0_i32_0 = arith.constant 0 : i32
    %c0_i32_1 = arith.constant 0 : i32
    return %arg1, %c0_i32, %c0_i32_0 : i32, i32, i32
  }
  func.func @transform_9(%arg0: i32, %arg1: i32) -> (i32, i32, i32) {
    %c0_i32 = arith.constant 0 : i32
    %c0_i32_0 = arith.constant 0 : i32
    %c0_i32_1 = arith.constant 0 : i32
    return %arg1, %c0_i32, %c0_i32_0 : i32, i32, i32
  }
  func.func @transform_10(%arg0: i32, %arg1: i32) -> (i32, i32, i32) {
    %c0_i32 = arith.constant 0 : i32
    %c0_i32_0 = arith.constant 0 : i32
    %c0_i32_1 = arith.constant 0 : i32
    return %arg1, %c0_i32, %c0_i32_0 : i32, i32, i32
  }
  func.func @transform_11(%arg0: i32, %arg1: i32) -> (i32, i32, i32) {
    %c0_i32 = arith.constant 0 : i32
    %c0_i32_0 = arith.constant 0 : i32
    %c0_i32_1 = arith.constant 0 : i32
    return %arg1, %c0_i32, %c0_i32_0 : i32, i32, i32
  }
  func.func @transform_12(%arg0: i32, %arg1: i32) -> (i32, i32, i32) {
    %c0_i32 = arith.constant 0 : i32
    %c0_i32_0 = arith.constant 0 : i32
    %c0_i32_1 = arith.constant 0 : i32
    return %arg1, %c0_i32, %c0_i32_0 : i32, i32, i32
  }
  func.func @transform_13(%arg0: i32, %arg1: i32) -> (i32, i32) {
    %c0_i32 = arith.constant 0 : i32
    %c0_i32_0 = arith.constant 0 : i32
    %c0_i32_1 = arith.constant 0 : i32
    return %c0_i32, %c0_i32_0 : i32, i32
  }
  func.func @transform_14(%arg0: i32, %arg1: i32) -> (i32, i32) {
    %c0_i32 = arith.constant 0 : i32
    %c0_i32_0 = arith.constant 0 : i32
    %c0_i32_1 = arith.constant 0 : i32
    return %c0_i32, %c0_i32_0 : i32, i32
  }
  func.func @transform_15(%arg0: i32, %arg1: i32) -> (i32, i32) {
    %c0_i32 = arith.constant 0 : i32
    %c0_i32_0 = arith.constant 0 : i32
    return %arg0, %c0_i32 : i32, i32
  }
}

</mosaic_0001>

<bundles_post_ra>
// kernel: tpu_custom_call.1
= control target key start
LH: loop header
LB: loop body
LE: loop exit
PB: predicated region body
PF: predicated region fallthrough
CT: control target
= control target key end

     0   :  { %s4820_s0 = inlined_call_operand.hbm [shape: f32[16,128], index: 0, kind: input, shape index: {}, may-alias: {0,15}]   ;;  %s4821_s1 = inlined_call_operand.hbm [shape: bf16[2,128,384], index: 1, kind: input, shape index: {}]   ;;  %s4822_s2 = inlined_call_operand.hbm [shape: f32[2,1,384], index: 2, kind: input, shape index: {}]   ;;  %s4823_s3 = inlined_call_operand.hbm [shape: bf16[2,128,128], index: 3, kind: input, shape index: {}]   ;;  %s4824_s4 = inlined_call_operand.hbm [shape: f32[2,1,128], index: 4, kind: input, shape index: {}]   ;;  %s4825_s5 = inlined_call_operand.hbm [shape: bf16[2,128,256], index: 5, kind: input, shape index: {}]   ;;  %s4826_s6 = inlined_call_operand.hbm [shape: f32[2,1,256], index: 6, kind: input, shape index: {}]   ;;  %s4827_s7 = inlined_call_operand.hbm [shape: bf16[2,256,128], index: 7, kind: input, shape index: {}]   ;;  %s4828_s8 = inlined_call_operand.hbm [shape: f32[2,1,128], index: 8, kind: input, shape index: {}]   ;;  %s4829_s9 = inlined_call_operand.hbm [shape: f32[2,1,128], index: 9, kind: input, shape index: {}]   ;;  %s4830_s10 = inlined_call_operand.hbm [shape: f32[2,1,128], index: 10, kind: input, shape index: {}]   ;;  %s4831_s11 = inlined_call_operand.hbm [shape: f32[2,1,128], index: 11, kind: input, shape index: {}]   ;;  %s4832_s12 = inlined_call_operand.hbm [shape: f32[2,1,128], index: 12, kind: input, shape index: {}]   ;;  %s4833_s13 = inlined_call_operand.hbm [shape: f32[1,128], index: 13, kind: input, shape index: {}]   ;;  %s4834_s14 = inlined_call_operand.hbm [shape: f32[1,128], index: 14, kind: input, shape index: {}]   ;;  %s4835_s15 = inlined_call_operand.hbm [shape: f32[16,128], index: 15, kind: output, shape index: {}, may-alias: {0,15}]  }
   0x1   :  { %4885 = sst [smem:[#allocation47_spill]] %s4820_s0 }
   0x2   :  { %4886 = sst [smem:[#allocation48_spill]] %s4821_s1 }
   0x3   :  { %4887 = sst [smem:[#allocation49_spill]] %s4822_s2 }
   0x4   :  { %4888 = sst [smem:[#allocation50_spill]] %s4823_s3 }
   0x5   :  { %4889 = sst [smem:[#allocation51_spill]] %s4824_s4 }
   0x6   :  { %4890 = sst [smem:[#allocation52_spill]] %s4825_s5 }
   0x7   :  { %4891 = sst [smem:[#allocation53_spill]] %s4826_s6 }
   0x8   :  { %4892 = sst [smem:[#allocation54_spill]] %s4827_s7 }
   0x9   :  { %4893 = sst [smem:[#allocation55_spill]] %s4828_s8 }
   0xa   :  { %4894 = sst [smem:[#allocation56_spill]] %s4829_s9 }
   0xb   :  { %4895 = sst [smem:[#allocation57_spill]] %s4830_s10 }
   0xc   :  { %4896 = sst [smem:[#allocation58_spill]] %s4831_s11 }
   0xd   :  { %4897 = sst [smem:[#allocation59_spill]] %s4832_s12 }
   0xe   :  { %4898 = sst [smem:[#allocation60_spill]] %s4833_s13 }
   0xf   :  { %4899 = sst [smem:[#allocation61_spill]] %s4834_s14 }
  0x10   :  { %4900 = sst [smem:[#allocation62_spill]] %s4835_s15 }
  0x11   :  { %20 = vsyncpa [#allocation3], 0 }
  0x12   :  { %22 = vsyncpa [#allocation3 + $0x1], 0 }
  0x13   :  { %23 = vsyncpa [#allocation6], 0 }
  0x14   :  { %25 = vsyncpa [#allocation6 + $0x1], 0 }
  0x15   :  { %26 = vsyncpa [#allocation9], 0 }
  0x16   :  { %28 = vsyncpa [#allocation9 + $0x1], 0 }
  0x17   :  { %29 = vsyncpa [#allocation12], 0 }
  0x18   :  { %31 = vsyncpa [#allocation12 + $0x1], 0 }
  0x19   :  { %32 = vsyncpa [#allocation15], 0 }
  0x1a   :  { %34 = vsyncpa [#allocation15 + $0x1], 0 }
  0x1b   :  { %35 = vsyncpa [#allocation18], 0 }
  0x1c   :  { %37 = vsyncpa [#allocation18 + $0x1], 0 }
  0x1d   :  { %38 = vsyncpa [#allocation21], 0 }
  0x1e   :  { %40 = vsyncpa [#allocation21 + $0x1], 0 }
  0x1f   :  { %41 = vsyncpa [#allocation24], 0 }
  0x20   :  { %42 = vsyncpa [#allocation4], 0 }
  0x21   :  { %44 = vsyncpa [#allocation4 + $0x1], 0  ;;  %s3871_s18 = smov 0   ;;  %s3873_s19 = smov 0  }
  0x22   :  { %s3875_s20 = smov 0   ;;  %s3877_s21 = smov 0  }
  0x23   :  { %s3879_s22 = smov 0   ;;  %s3881_s23 = smov 0  }
  0x24   :  { %s3883_s24 = smov 0   ;;  %s3885_s25 = smov 0  }
  0x25   :  { %s3887_s26 = smov 0   ;;  %s3889_s27 = smov 0  }
  0x26   :  { %s3891_s28 = smov 0  }
  0x27 LB: > { %4901 = sst [smem:[#allocation36_spill]] %s3725_s19  ;;  %s3925_s29 = sadd.s32 4294967295, %s3761_s28   ;;  %s3761_s28 = sphi %s3891_s28, %s50_s28   ;;  %s3757_s27 = sphi %s3889_s27, %s4990_s27   ;;  %s3753_s26 = sphi %s3887_s26, %s4989_s26   ;;  %s3749_s25 = sphi %s3885_s25, %s4988_s25   ;;  %s3745_s24 = sphi %s3883_s24, %s4987_s24   ;;  %s3741_s23 = sphi %s3881_s23, %s4995_s23   ;;  %s3737_s22 = sphi %s3879_s22, %s4994_s22   ;;  %s3733_s21 = sphi %s3877_s21, %s4993_s21   ;;  %s3729_s20 = sphi %s3875_s20, %s4992_s20   ;;  %s3725_s19 = sphi %s3873_s19, %s4991_s19   ;;  %s3721_s18 = sphi %s3871_s18, %s4984_s18  }
  0x28   : > { %4902 = sst [smem:[#allocation37_spill]] %s3729_s20  ;;  %p4848_p0 = scmp.eq.s32.totalorder %s3761_s28, 0 }
  0x29   : > { %4903 = sst [smem:[#allocation38_spill]] %s3745_s24  ;;  %p4847_p1 = scmp.eq.s32.totalorder %s3925_s29, 0 }
  0x2a   : > { %4904 = sst [smem:[#allocation39_spill]] %s3749_s25  ;;  %p102_p2 = scmp.ne.s32.totalorder %s3729_s20, %s3725_s19 }
  0x2b   : > { %4905 = sst [smem:[#allocation40_spill]] %s3753_s26  ;;  %p108_p3 = scmp.ne.s32.totalorder %s3725_s19, %s3721_s18 }
  0x2c   : > { %4906 = sst [smem:[#allocation41_spill]] %s3757_s27  ;;  %p2592_p5 = scmp.ge.s32.totalorder %s3761_s28, 1 }
  0x2d   : > { %4907 = sst [smem:[#allocation42_spill]] %s3925_s29  ;;  %p104_p6 = por %p102_p2, %p4848_p0 }
  0x2e   : > { %p3939_p7 = por %p108_p3, %p4847_p1  ;;  %p473_p8 = scmp.lt.s32.totalorder %s3761_s28, 5 }
  0x2f   : > { %s3763_s30 = smov [#allocation23]   ;;  %p4846_p10 = scmp.lt.s32.totalorder %s3761_s28, 4 }
  0x30   : > { %s4908_s16 = scalar_select %p3939_p7, 1, 0 }
  0x31   : > { %p3944_p9 = pnand %p2592_p5, %p473_p8  ;;  %s486_s15 = sshll.u32 %s3763_s30, 4  ;;  %s487_s15 = int_to_ptr.vmem [resolvable:$true] %s486_s15 }
  0x32   : > { %4909 = sst [smem:[#allocation43_spill]] %s4908_s16  ;;  %s3952_s18 = sand.u32 1, %s3729_s20  }
  0x33   : > { %s4910_s17 = scalar_select %p3944_p9, 1, 0 }
  0x34   : > { %p2904_p11 = pneg %p3944_p9  ;;  %p3956_p12 = pnand %p4846_p10, %p104_p6 }
  0x35   : > { %4911 = sst [smem:[#allocation44_spill]] %s4910_s17  ;;  %s3967_s16 = sand.u32 1, %s3761_s28  }
  0x36   : > { %s4912_s25 = scalar_select %p3956_p12, 1, 0 }
  0x37   : > { %p3962_p13 = pnand %p2904_p11, %p4847_p1  ;;  %s4914_s13 = sld [smem:[#allocation60_spill]] }
  0x39   : > { %s4913_s24 = scalar_select %p3962_p13, 1, 0 }
  0x3a   : > { %p4854_p3 = pneg %p3962_p13 }
  0x3d   : > { %s3165_s17 = scalar_lea.hbm %s4914_s13, 16 }
  0x3e   : > { %p3166_p2 = scmp.ne.s32.totalorder %s4914_s13, %s3165_s17  ;;  %p3172_p8 = scmp.lt.u32.totalorder %s3165_s17, %s4914_s13 }
  0x40   : > { %p3168_p5 = pnand %p4854_p3, %p3166_p2 }
  0x42   : > { %p3169_p6 = pneg %p3168_p5 }
  0x44   : > { %p3174_p11 = pnand %p3172_p8, %p3169_p6 }
  0x46   : > { %3177 = shalt.err (!%p3174_p11)
}
  0x47   : > { %s3178_s4 = scalar_lea.vmem %s487_s15, 16  ;;  %s3185_s10 = scalar_lea.vmem %s487_s15, 32 }
  0x48   : > { %p3179_p10 = scmp.ne.s32.totalorder %s487_s15, %s3178_s4  ;;  %p3186_p0 = scmp.lt.s32.totalorder %s487_s15, %s487_s15 }
  0x49   : > { %p3187_p7 = scmp.lt.s32.totalorder %s3185_s10, %s3178_s4 }
  0x4a   : > { %p3181_p4 = pnand %p3179_p10, %p4854_p3 }
  0x4b   : > { %p3188_p9 = por %p3187_p7, %p3186_p0 }
  0x4c   : > { %p3182_p1 = pneg %p3181_p4 }
  0x4e   : > { %p3189_p12 = pnand %p3188_p9, %p3182_p1 }
  0x50   : > { %3192 = shalt.err (!%p3189_p12)
}
  0x51   : > { %2907 = dma.hbm_to_vmem [thread:$0]  (!%p3962_p13), %s4914_s13, 16, %s487_s15, [#allocation24]  }
  0x52   : > { %s2862_s8 = smul.u32 192, %s3952_s18  ;;  %s4915_s1 = sld [smem:[#allocation48_spill]] }
  0x53   : > { %s2863_s19 = smul.u32 3072, %s3753_s26  ;;  %s4862_s6 = scalar_lea.sflag [#allocation6], %s3967_s16 }
  0x54   : > { %s530_s10 = scalar_lea.vmem [#allocation5], %s2862_s8  ;;  %p4916_p1 = scmp.ne.s32.totalorder %s4912_s25, 0 }
  0x55   : > { %s537_s2 = sshll.u32 %s530_s10, 4  ;;  %s3998_s2 = int_to_ptr.vmem [resolvable:$true] %s537_s2 }
  0x56   : > { %p4006_p4 = pneg %p4916_p1 }
  0x58   : > { %s3996_s4 = scalar_lea.hbm %s4915_s1, %s2863_s19  ;;  %s3198_s8 = scalar_lea.hbm %s4915_s1, 6144 }
  0x59   : > { %s3193_s0 = scalar_lea.hbm %s3996_s4, 3072  ;;  %p3199_p10 = scmp.lt.u32.totalorder %s3996_s4, %s4915_s1 }
  0x5a   : > { %p3194_p0 = scmp.ne.s32.totalorder %s3996_s4, %s3193_s0  ;;  %p3200_p12 = scmp.lt.u32.totalorder %s3198_s8, %s3193_s0 }
  0x5b   : > { %s4917_s15 = scalar_select %p4006_p4, 1, 0 }
  0x5c   : > { %p3196_p7 = pnand %p4006_p4, %p3194_p0  ;;  %p3201_p2 = por %p3200_p12, %p3199_p10 }
  0x5d   : > { %p3202_p5 = scmp.lt.u32.totalorder %s3193_s0, %s3996_s4 }
  0x5e   : > { %p3197_p9 = pneg %p3196_p7 }
  0x5f   : > { %p3203_p6 = por %p3202_p5, %p3201_p2 }
  0x61   : > { %p3204_p8 = pnand %p3203_p6, %p3197_p9 }
  0x63   : > { %3207 = shalt.err (!%p3204_p8)
}
  0x64   : > { %s3208_s12 = scalar_lea.vmem %s3998_s2, 3072  ;;  %s3764_s19 = smov [#allocation5]  }
  0x65   : > { %p3209_p11 = scmp.ne.s32.totalorder %s3998_s2, %s3208_s12  ;;  %s3213_s17 = sshll.u32 %s3764_s19, 4  ;;  %s3214_s17 = int_to_ptr.vmem [resolvable:$false] %s3213_s17 }
  0x66   : > { %s3215_s30 = scalar_lea.vmem %s3214_s17, 6144  ;;  %p3216_p3 = scmp.lt.s32.totalorder %s3998_s2, %s3214_s17 }
  0x67   : > { %p3211_p0 = pnand %p3209_p11, %p4006_p4  ;;  %p3217_p13 = scmp.lt.s32.totalorder %s3215_s30, %s3208_s12 }
  0x69   : > { %p3212_p7 = pneg %p3211_p0  ;;  %p3218_p10 = por %p3217_p13, %p3216_p3 }
  0x6b   : > { %p3219_p12 = pnand %p3218_p10, %p3212_p7 }
  0x6d   : > { %3222 = shalt.err (!%p3219_p12)
}
  0x6e   : > { %s3765_s0 = smov 192   ;;  %s3766_s8 = smov 12  }
  0x6f   : > { %2917 = dma.hbm_to_vmem [thread:$0]  (!%p4916_p1), %s3996_s4, 3072, %s3998_s2, %s4862_s6, %s3765_s0, %s3765_s0, %s3766_s8  }
  0x70   : > { %s2714_s10 = sshll.u32 %s3753_s26, 10  ;;  %s4918_s3 = sld [smem:[#allocation50_spill]] }
  0x71   : > { %s4919_s30 = sshll.u32 %s3952_s18, 6  ;;  %s4863_s20 = scalar_lea.sflag [#allocation9], %s3967_s16 }
  0x72   : > { %s570_s1 = scalar_lea.vmem [#allocation8], %s4919_s30 }
  0x73   : > { %s577_s13 = sshll.u32 %s570_s1, 4  ;;  %s4039_s13 = int_to_ptr.vmem [resolvable:$true] %s577_s13 }
  0x76   : > { %s4035_s12 = scalar_lea.hbm %s4918_s3, %s2714_s10  ;;  %s3228_s0 = scalar_lea.hbm %s4918_s3, 2048 }
  0x77   : > { %s3223_s29 = scalar_lea.hbm %s4035_s12, 1024  ;;  %p3229_p2 = scmp.lt.u32.totalorder %s4035_s12, %s4918_s3 }
  0x78   : > { %p3224_p13 = scmp.ne.s32.totalorder %s4035_s12, %s3223_s29  ;;  %p3230_p5 = scmp.lt.u32.totalorder %s3228_s0, %s3223_s29 }
  0x79   : > { %p3232_p8 = scmp.lt.u32.totalorder %s3223_s29, %s4035_s12 }
  0x7a   : > { %p3226_p3 = pnand %p3224_p13, %p4006_p4  ;;  %p3231_p6 = por %p3230_p5, %p3229_p2 }
  0x7c   : > { %p3227_p9 = pneg %p3226_p3  ;;  %p3233_p11 = por %p3232_p8, %p3231_p6 }
  0x7e   : > { %p3234_p0 = pnand %p3233_p11, %p3227_p9 }
  0x80   : > { %3237 = shalt.err (!%p3234_p0)
}
  0x81   : > { %s3238_s1 = scalar_lea.vmem %s4039_s13, 1024  ;;  %s3767_s19 = smov [#allocation8]  }
  0x82   : > { %p3239_p7 = scmp.ne.s32.totalorder %s4039_s13, %s3238_s1  ;;  %s3243_s17 = sshll.u32 %s3767_s19, 4  ;;  %s3244_s17 = int_to_ptr.vmem [resolvable:$false] %s3243_s17 }
  0x83   : > { %s3245_s30 = scalar_lea.vmem %s3244_s17, 2048  ;;  %p3246_p13 = scmp.lt.s32.totalorder %s4039_s13, %s3244_s17 }
  0x84   : > { %p3241_p10 = pnand %p3239_p7, %p4006_p4  ;;  %p3247_p3 = scmp.lt.s32.totalorder %s3245_s30, %s3238_s1 }
  0x86   : > { %p3242_p12 = pneg %p3241_p10  ;;  %p3248_p2 = por %p3247_p3, %p3246_p13 }
  0x88   : > { %p3249_p5 = pnand %p3248_p2, %p3242_p12 }
  0x8a   : > { %3252 = shalt.err (!%p3249_p5)
}
  0x8b   : > { %s4864_s29 = smov 64   ;;  %s4865_s2 = smov 4  }
  0x8c   : > { %2923 = dma.hbm_to_vmem [thread:$0]  (!%p4916_p1), %s4035_s12, 1024, %s4039_s13, %s4863_s20, %s4864_s29, %s4864_s29, %s4865_s2  }
  0x8d   : > { %s2604_s4 = sshll.u32 %s3952_s18, 7  ;;  %s2715_s0 = sshll.u32 %s3753_s26, 11 }
  0x8e   : > { %s4920_s5 = sld [smem:[#allocation52_spill]]  ;;  %s608_s19 = scalar_lea.vmem [#allocation11], %s2604_s4 }
  0x8f   : > { %s615_s17 = sshll.u32 %s608_s19, 4  ;;  %s4873_s30 = scalar_lea.sflag [#allocation12], %s3967_s16  ;;  %s4079_s17 = int_to_ptr.vmem [resolvable:$true] %s615_s17 }
  0x94   : > { %s4075_s1 = scalar_lea.hbm %s4920_s5, %s2715_s0  ;;  %s3258_s8 = scalar_lea.hbm %s4920_s5, 4096 }
  0x95   : > { %s3253_s6 = scalar_lea.hbm %s4075_s1, 2048  ;;  %p3259_p11 = scmp.lt.u32.totalorder %s4075_s1, %s4920_s5 }
  0x96   : > { %p3254_p9 = scmp.ne.s32.totalorder %s4075_s1, %s3253_s6  ;;  %p3260_p0 = scmp.lt.u32.totalorder %s3258_s8, %s3253_s6 }
  0x97   : > { %p3262_p10 = scmp.lt.u32.totalorder %s3253_s6, %s4075_s1 }
  0x98   : > { %p3256_p6 = pnand %p3254_p9, %p4006_p4  ;;  %p3261_p7 = por %p3260_p0, %p3259_p11 }
  0x9a   : > { %p3257_p8 = pneg %p3256_p6  ;;  %p3263_p12 = por %p3262_p10, %p3261_p7 }
  0x9c   : > { %p3264_p13 = pnand %p3263_p12, %p3257_p8 }
  0x9e   : > { %3267 = shalt.err (!%p3264_p13)
}
  0x9f   : > { %s3268_s19 = scalar_lea.vmem %s4079_s17, 2048  ;;  %s3770_s13 = smov [#allocation11]  }
  0xa0   : > { %p3269_p3 = scmp.ne.s32.totalorder %s4079_s17, %s3268_s19  ;;  %s3273_s12 = sshll.u32 %s3770_s13, 4  ;;  %s3274_s12 = int_to_ptr.vmem [resolvable:$false] %s3273_s12 }
  0xa1   : > { %s3275_s20 = scalar_lea.vmem %s3274_s12, 4096  ;;  %p3276_p9 = scmp.lt.s32.totalorder %s4079_s17, %s3274_s12 }
  0xa2   : > { %p3271_p2 = pnand %p3269_p3, %p4006_p4  ;;  %p3277_p6 = scmp.lt.s32.totalorder %s3275_s20, %s3268_s19 }
  0xa4   : > { %p3272_p5 = pneg %p3271_p2  ;;  %p3278_p11 = por %p3277_p6, %p3276_p9 }
  0xa6   : > { %p3279_p0 = pnand %p3278_p11, %p3272_p5 }
  0xa8   : > { %3282 = shalt.err (!%p3279_p0)
}
  0xa9   : > { %s3771_s6 = smov 128   ;;  %s3772_s8 = smov 8  }
  0xaa   : > { %2929 = dma.hbm_to_vmem [thread:$0]  (!%p4916_p1), %s4075_s1, 2048, %s4079_s17, %s4873_s30, %s3771_s6, %s3771_s6, %s3772_s8  }
  0xab   : > { %s4921_s7 = sld [smem:[#allocation54_spill]]  ;;  %s648_s12 = scalar_lea.vmem [#allocation14], %s2604_s4 }
  0xac   : > { %s655_s20 = sshll.u32 %s648_s12, 4  ;;  %s4117_s29 = sshll.u32 %s3753_s26, 4  ;;  %s4114_s20 = int_to_ptr.vmem [resolvable:$true] %s655_s20 }
  0xad   : > { %s4872_s2 = scalar_lea.sflag [#allocation15], %s3967_s16 }
  0xb1   : > { %s4110_s13 = scalar_lea.hbm %s4921_s7, %s2715_s0  ;;  %s3288_s17 = scalar_lea.hbm %s4921_s7, 4096 }
  0xb2   : > { %s3283_s3 = scalar_lea.hbm %s4110_s13, 2048  ;;  %p3289_p12 = scmp.lt.u32.totalorder %s4110_s13, %s4921_s7 }
  0xb3   : > { %p3284_p8 = scmp.ne.s32.totalorder %s4110_s13, %s3283_s3  ;;  %p3290_p13 = scmp.lt.u32.totalorder %s3288_s17, %s3283_s3 }
  0xb4   : > { %p3292_p2 = scmp.lt.u32.totalorder %s3283_s3, %s4110_s13 }
  0xb5   : > { %p3286_p7 = pnand %p3284_p8, %p4006_p4  ;;  %p3291_p3 = por %p3290_p13, %p3289_p12 }
  0xb7   : > { %p3287_p10 = pneg %p3286_p7  ;;  %p3293_p5 = por %p3292_p2, %p3291_p3 }
  0xb9   : > { %p3294_p9 = pnand %p3293_p5, %p3287_p10 }
  0xbb   : > { %3297 = shalt.err (!%p3294_p9)
}
  0xbc   : > { %s3298_s4 = scalar_lea.vmem %s4114_s20, 2048  ;;  %s3773_s10 = smov [#allocation14]  }
  0xbd   : > { %p3299_p6 = scmp.ne.s32.totalorder %s4114_s20, %s3298_s4  ;;  %s3303_s19 = sshll.u32 %s3773_s10, 4  ;;  %s3304_s19 = int_to_ptr.vmem [resolvable:$false] %s3303_s19 }
  0xbe   : > { %s3305_s12 = scalar_lea.vmem %s3304_s19, 4096  ;;  %p3306_p8 = scmp.lt.s32.totalorder %s4114_s20, %s3304_s19 }
  0xbf   : > { %p3301_p11 = pnand %p3299_p6, %p4006_p4  ;;  %p3307_p7 = scmp.lt.s32.totalorder %s3305_s12, %s3298_s4 }
  0xc1   : > { %p3302_p0 = pneg %p3301_p11  ;;  %p3308_p12 = por %p3307_p7, %p3306_p8 }
  0xc3   : > { %p3309_p13 = pnand %p3308_p12, %p3302_p0 }
  0xc5   : > { %3312 = shalt.err (!%p3309_p13)
}
  0xc6   : > { %s4922_s3 = smov 4   ;;  %s4923_s1 = smov 64  }
  0xc7   : > { %2935 = dma.hbm_to_vmem [thread:$0]  (!%p4916_p1), %s4110_s13, 2048, %s4114_s20, %s4872_s2, %s4923_s1, %s4923_s1, %s4922_s3  }
  0xc8   : > { %s4924_s9 = sld [smem:[#allocation56_spill]]  ;;  %s685_s8 = scalar_lea.vmem [#allocation17], %s3952_s18 }
  0xc9   : > { %s692_s4 = sshll.u32 %s685_s8, 4  ;;  %s4867_s10 = scalar_lea.sflag [#allocation18], %s3967_s16  ;;  %s693_s4 = int_to_ptr.vmem [resolvable:$true] %s692_s4 }
  0xce   : > { %s4150_s6 = scalar_lea.hbm %s4924_s9, %s4117_s29  ;;  %s3318_s20 = scalar_lea.hbm %s4924_s9, 32 }
  0xcf   : > { %s3313_s19 = scalar_lea.hbm %s4150_s6, 16  ;;  %p3319_p5 = scmp.lt.u32.totalorder %s4150_s6, %s4924_s9 }
  0xd0   : > { %p3314_p10 = scmp.ne.s32.totalorder %s4150_s6, %s3313_s19  ;;  %p3320_p9 = scmp.lt.u32.totalorder %s3318_s20, %s3313_s19 }
  0xd1   : > { %p3322_p11 = scmp.lt.u32.totalorder %s3313_s19, %s4150_s6 }
  0xd2   : > { %p3316_p3 = pnand %p3314_p10, %p4006_p4  ;;  %p3321_p6 = por %p3320_p9, %p3319_p5 }
  0xd4   : > { %p3317_p2 = pneg %p3316_p3  ;;  %p3323_p0 = por %p3322_p11, %p3321_p6 }
  0xd6   : > { %p3324_p8 = pnand %p3323_p0, %p3317_p2 }
  0xd8   : > { %3327 = shalt.err (!%p3324_p8)
}
  0xd9   : > { %s3328_s0 = scalar_lea.vmem %s693_s4, 16  ;;  %s3774_s17 = smov [#allocation17]  }
  0xda   : > { %p3329_p7 = scmp.ne.s32.totalorder %s693_s4, %s3328_s0  ;;  %s3333_s8 = sshll.u32 %s3774_s17, 4  ;;  %s3334_s8 = int_to_ptr.vmem [resolvable:$false] %s3333_s8 }
  0xdb   : > { %s3335_s12 = scalar_lea.vmem %s3334_s8, 32  ;;  %p3336_p10 = scmp.lt.s32.totalorder %s693_s4, %s3334_s8 }
  0xdc   : > { %p3331_p12 = pnand %p3329_p7, %p4006_p4  ;;  %p3337_p3 = scmp.lt.s32.totalorder %s3335_s12, %s3328_s0 }
  0xde   : > { %p3332_p13 = pneg %p3331_p12  ;;  %p3338_p1 = por %p3337_p3, %p3336_p10 }
  0xe0   : > { %p3339_p5 = pnand %p3338_p1, %p3332_p13 }
  0xe2   : > { %3342 = shalt.err (!%p3339_p5)
}
  0xe3   : > { %p4925_p9 = scmp.ne.s32.totalorder %s4912_s25, 0  ;;  %s4926_s11 = sld [smem:[#allocation58_spill]] }
  0xe4   : > { %s719_s3 = scalar_lea.vmem [#allocation20], %s3952_s18  ;;  %s3775_s0 = smov [#allocation25]  }
  0xe5   : > { %2941 = dma.hbm_to_vmem [thread:$0]  (!%p4925_p9), %s4150_s6, 16, %s693_s4, %s4867_s10  }
  0xe6   : > { %s726_s1 = sshll.u32 %s719_s3, 4  ;;  %s4182_s17 = sshll.u32 %s3775_s0, 4  ;;  %s4180_s1 = int_to_ptr.vmem [resolvable:$true] %s726_s1  ;;  %s498_s17 = int_to_ptr.vmem [resolvable:$true] %s4182_s17 }
  0xe7   : > { %s4871_s8 = scalar_lea.sflag [#allocation21], %s3967_s16 }
  0xe9   : > { %s4177_s20 = scalar_lea.hbm %s4926_s11, %s4117_s29  ;;  %s3348_s19 = scalar_lea.hbm %s4926_s11, 32 }
  0xea   : > { %s3343_s12 = scalar_lea.hbm %s4177_s20, 16  ;;  %p3349_p11 = scmp.lt.u32.totalorder %s4177_s20, %s4926_s11 }
  0xeb   : > { %p3344_p1 = scmp.ne.s32.totalorder %s4177_s20, %s3343_s12  ;;  %p3350_p0 = scmp.lt.u32.totalorder %s3348_s19, %s3343_s12 }
  0xec   : > { %p3352_p7 = scmp.lt.u32.totalorder %s3343_s12, %s4177_s20 }
  0xed   : > { %p3346_p2 = pnand %p3344_p1, %p4006_p4  ;;  %p3351_p8 = por %p3350_p0, %p3349_p11 }
  0xef   : > { %p3347_p6 = pneg %p3346_p2  ;;  %p3353_p12 = por %p3352_p7, %p3351_p8 }
  0xf1   : > { %p3354_p13 = pnand %p3353_p12, %p3347_p6 }
  0xf3   : > { %3357 = shalt.err (!%p3354_p13)
}
  0xf4   : > { %s3358_s3 = scalar_lea.vmem %s4180_s1, 16  ;;  %s3776_s0 = smov [#allocation20]  }
  0xf5   : > { %p3359_p10 = scmp.ne.s32.totalorder %s4180_s1, %s3358_s3  ;;  %s3363_s6 = sshll.u32 %s3776_s0, 4  ;;  %s3364_s6 = int_to_ptr.vmem [resolvable:$false] %s3363_s6 }
  0xf6   : > { %s3365_s10 = scalar_lea.vmem %s3364_s6, 32  ;;  %p3366_p1 = scmp.lt.s32.totalorder %s4180_s1, %s3364_s6 }
  0xf7   : > { %p3361_p3 = pnand %p3359_p10, %p4006_p4  ;;  %p3367_p2 = scmp.lt.s32.totalorder %s3365_s10, %s3358_s3 }
  0xf9   : > { %p3362_p5 = pneg %p3361_p3  ;;  %p3368_p11 = por %p3367_p2, %p3366_p1 }
  0xfb   : > { %p3369_p0 = pnand %p3368_p11, %p3362_p5 }
  0xfd   : > { %3372 = shalt.err (!%p3369_p0)
}
  0xfe   : > { %2947 = dma.hbm_to_vmem [thread:$0]  (!%p4925_p9), %s4177_s20, 16, %s4180_s1, %s4871_s8  }
  0xff   : > { %s4927_s14 = sld [smem:[#allocation61_spill]]  ;;  %p4928_p8 = scmp.ne.s32.totalorder %s4913_s24, 0 }
 0x101   : > { %p4929_p7 = pneg %p4928_p8 }
 0x105   : > { %s3373_s19 = scalar_lea.hbm %s4927_s14, 16 }
 0x106   : > { %p3374_p6 = scmp.ne.s32.totalorder %s4927_s14, %s3373_s19  ;;  %p3380_p10 = scmp.lt.u32.totalorder %s3373_s19, %s4927_s14 }
 0x108   : > { %p3376_p12 = pnand %p3374_p6, %p4929_p7 }
 0x10a   : > { %p3377_p13 = pneg %p3376_p12 }
 0x10c   : > { %p3382_p3 = pnand %p3380_p10, %p3377_p13 }
 0x10e   : > { %3385 = shalt.err (!%p3382_p3)
}
 0x10f   : > { %s3386_s20 = scalar_lea.vmem %s498_s17, 16  ;;  %p4930_p1 = pmov %p4929_p7 }
 0x110   : > { %p3387_p5 = scmp.ne.s32.totalorder %s498_s17, %s3386_s20  ;;  %s3393_s1 = scalar_lea.vmem %s498_s17, 32 }
 0x111   : > { %p3394_p0 = scmp.lt.s32.totalorder %s498_s17, %s498_s17  ;;  %p3395_p9 = scmp.lt.s32.totalorder %s3393_s1, %s3386_s20 }
 0x112   : > { %p3389_p2 = pnand %p3387_p5, %p4930_p1 }
 0x113   : > { %p3396_p4 = por %p3395_p9, %p3394_p0 }
 0x114   : > { %p3390_p11 = pneg %p3389_p2 }
 0x116   : > { %p3397_p6 = pnand %p3396_p4, %p3390_p11 }
 0x118   : > { %3400 = shalt.err (!%p3397_p6)
}
 0x119   : > { %s4931_s4 = sld [smem:[#allocation42_spill]]  ;;  %s2591_s24 = sadd.s32 4294967294, %s3761_s28  }
 0x11a   : > { %2910 = dma.hbm_to_vmem [thread:$0]  (!%p4928_p8), %s4927_s14, 16, %s498_s17, [#allocation24]  }
 0x11b   : > { %s4932_s19 = sld [smem:[#allocation37_spill]]  ;;  %s59_s13 = sadd.s32 1, %s3753_s26 }
 0x11c   : > { %s62_s0 = sadd.s32 1, %s3757_s27  ;;  %p60_p4 = scmp.ge.s32.totalorder %s59_s13, 2 }
 0x11d   : > { %s69_s3 = sadd.s32 1, %s3741_s23  ;;  %p76_p9 = scmp.ne.s32.totalorder %s3741_s23, %s3737_s22 }
 0x11e   : > { %p82_p7 = scmp.ne.s32.totalorder %s3737_s22, %s3733_s21  ;;  %s4997_s13 = smov (%p60_p4, %s59_s13), 0 }
 0x11f   : > { %4933 = sst [smem:[#allocation45_spill]] %s4997_s13  ;;  %s4999_s0 = smov (!%p60_p4, %s62_s0), %s3757_s27 }
 0x120   : > { %p4934_p12 = scmp.eq.s32.totalorder %s3761_s28, 0  ;;  %p4936_p13 = scmp.eq.s32.totalorder %s4931_s4, 0 }
 0x121   : > { %p64_p3 = scmp.ge.s32.totalorder %s4999_s0, 2  ;;  %s92_s20 = ssub.s32 %s3753_s26, %s4997_s13 }
 0x122   : > { %p4242_p8 = por %p4934_p12, %p76_p9  ;;  %p4251_p10 = por %p4936_p13, %p82_p7 }
 0x123   : > { %p93_p5 = scmp.eq.s32.totalorder %s92_s20, 0  ;;  %p4938_p1 = scmp.eq.s32.totalorder %s4931_s4, 3 }
 0x124   : > { %s4937_s6 = scalar_select %p4251_p10, 1, 0 }
 0x125   : > { %p4259_p2 = por %p4938_p1, %p76_p9  ;;  %s5001_s0 = smov (%p64_p3, %s4999_s0), 0 }
 0x126   : > { %4940 = sst [smem:[#allocation46_spill]] %s5001_s0  ;;  %s4941_s10 = sadd.s32 1, %s4932_s19 }
 0x127   : > { %s4939_s1 = scalar_select %p4259_p2, 1, 0 }
 0x128   : > { %s5003_s19 = smov (!%p93_p5, %s4932_s19), %s4941_s10  ;;  %s66_s12 = ssub.s32 %s3757_s27, %s5001_s0 }
 0x129   : > { %p466_p11 = scmp.eq.s32.totalorder %s2591_s24, 3  ;;  %p67_p0 = scmp.eq.s32.totalorder %s66_s12, 0 }
 0x12a   : > { %s508_s8 = sand.u32 1, %s3741_s23   ;;  %s2597_s30 = sshll.u32 %s3757_s27, 7 }
 0x12b   : > { %p4276_p6 = por %p466_p11, %p82_p7  ;;  %s2596_s2 = sshll.u32 %s508_s8, 3 }
 0x12c   : > { %s4281_s4 = scalar_select %p67_p0, %s3741_s23, %s69_s3  }
 0x12d   : > { %s4942_s20 = scalar_select %p4276_p6, 1, 0 }
 0x12e   : > { %s4943_s9 = sld [smem:[#allocation47_spill]]  ;;  %s512_s24 = scalar_lea.vmem [#allocation2], %s2596_s2 }
 0x12f   : > { %s519_s10 = sshll.u32 %s512_s24, 4  ;;  %p4944_p4 = scmp.lt.s32.totalorder %s3761_s28, 4  ;;  %s4297_s10 = int_to_ptr.vmem [resolvable:$true] %s519_s10 }
 0x130   : > { %s2865_s5 = smul.u32 48, %s3753_s26  ;;  %s509_s7 = scalar_lea.sflag [#allocation3], %s508_s8 }
 0x131   : > { %p4293_p9 = pnand %p4944_p4, %p4242_p8 }
 0x133   : > { %p3403_p12 = pneg %p4293_p9 }
 0x134   : > { %s4287_s11 = scalar_lea.hbm %s4943_s9, %s2597_s30  ;;  %s3406_s24 = scalar_lea.hbm %s4943_s9, 256 }
 0x135   : > { %s3401_s30 = scalar_lea.hbm %s4287_s11, 128  ;;  %p3407_p8 = scmp.lt.u32.totalorder %s4287_s11, %s4943_s9 }
 0x136   : > { %p3402_p7 = scmp.ne.s32.totalorder %s4287_s11, %s3401_s30  ;;  %p3408_p5 = scmp.lt.u32.totalorder %s3406_s24, %s3401_s30 }
 0x137   : > { %p3410_p11 = scmp.lt.u32.totalorder %s3401_s30, %s4287_s11 }
 0x138   : > { %p3404_p13 = pnand %p3403_p12, %p3402_p7  ;;  %p3409_p1 = por %p3408_p5, %p3407_p8 }
 0x13a   : > { %p3405_p3 = pneg %p3404_p13  ;;  %p3411_p0 = por %p3410_p11, %p3409_p1 }
 0x13c   : > { %p3412_p4 = pnand %p3411_p0, %p3405_p3 }
 0x13e   : > { %3415 = shalt.err (!%p3412_p4)
}
 0x13f   : > { %s3416_s8 = scalar_lea.vmem %s4297_s10, 128  ;;  %s3777_s2 = smov [#allocation2]  }
 0x140   : > { %p3417_p7 = scmp.ne.s32.totalorder %s4297_s10, %s3416_s8  ;;  %s3421_s17 = sshll.u32 %s3777_s2, 4  ;;  %s3422_s17 = int_to_ptr.vmem [resolvable:$false] %s3421_s17 }
 0x141   : > { %s3423_s14 = scalar_lea.vmem %s3422_s17, 256  ;;  %p3424_p2 = scmp.lt.s32.totalorder %s4297_s10, %s3422_s17 }
 0x142   : > { %p3419_p13 = pnand %p3417_p7, %p3403_p12  ;;  %p3425_p8 = scmp.lt.s32.totalorder %s3423_s14, %s3416_s8 }
 0x144   : > { %p3420_p6 = pneg %p3419_p13  ;;  %p3426_p5 = por %p3425_p8, %p3424_p2 }
 0x146   : > { %p3427_p1 = pnand %p3426_p5, %p3420_p6 }
 0x148   : > { %3430 = shalt.err (!%p3427_p1)
}
 0x149   : > { %2914 = dma.hbm_to_vmem [thread:$0]  (!%p4293_p9), %s4287_s11, 128, %s4297_s10, %s509_s7  }
 0x14a   : > { %s4946_s24 = sld [smem:[#allocation49_spill]]  ;;  %s4948_s17 = smul.u32 3, %s3952_s18 }
 0x14b   : > { %s4949_s13 = sld [smem:[#allocation51_spill]]  ;;  %p4950_p6 = scmp.ne.s32.totalorder %s4917_s15, 0 }
 0x14c   : > { %s551_s8 = scalar_lea.vmem [#allocation7], %s4948_s17 }
 0x14d   : > { %s559_s12 = sshll.u32 %s551_s8, 4  ;;  %s560_s12 = int_to_ptr.vmem [resolvable:$true] %s559_s12 }
 0x150   : > { %s4947_s2 = smov %s4946_s24  ;;  %s4331_s3 = scalar_lea.hbm %s4946_s24, %s2865_s5 }
 0x151   : > { %s4339_s27 = scalar_lea.hbm %s4949_s13, %s4117_s29  ;;  %s3431_s11 = scalar_lea.hbm %s4331_s3, 48 }
 0x152   : > { %p3432_p2 = scmp.ne.s32.totalorder %s4331_s3, %s3431_s11  ;;  %s3436_s7 = scalar_lea.hbm %s4947_s2, 96 }
 0x153   : > { %p3437_p3 = scmp.lt.u32.totalorder %s4331_s3, %s4947_s2  ;;  %p3438_p11 = scmp.lt.u32.totalorder %s3436_s7, %s3431_s11 }
 0x154   : > { %p3434_p9 = pnand %p3432_p2, %p4950_p6  ;;  %p3440_p4 = scmp.lt.u32.totalorder %s3431_s11, %s4331_s3 }
 0x155   : > { %p3439_p0 = por %p3438_p11, %p3437_p3 }
 0x156   : > { %p3435_p12 = pneg %p3434_p9 }
 0x157   : > { %p3441_p7 = por %p3440_p4, %p3439_p0 }
 0x159   : > { %p3442_p13 = pnand %p3441_p7, %p3435_p12 }
 0x15b   : > { %3445 = shalt.err (!%p3442_p13)
}
 0x15c   : > { %s3446_s9 = scalar_lea.vmem %s560_s12, 48  ;;  %s3778_s24 = smov [#allocation7]  }
 0x15d   : > { %p3447_p8 = scmp.ne.s32.totalorder %s560_s12, %s3446_s9  ;;  %s3451_s17 = sshll.u32 %s3778_s24, 4  ;;  %s3452_s17 = int_to_ptr.vmem [resolvable:$false] %s3451_s17 }
 0x15e   : > { %s3453_s8 = scalar_lea.vmem %s3452_s17, 96  ;;  %p3454_p2 = scmp.lt.s32.totalorder %s560_s12, %s3452_s17 }
 0x15f   : > { %p3449_p5 = pnand %p3447_p8, %p4950_p6  ;;  %p3455_p9 = scmp.lt.s32.totalorder %s3453_s8, %s3446_s9 }
 0x161   : > { %p3450_p1 = pneg %p3449_p5  ;;  %p3456_p10 = por %p3455_p9, %p3454_p2 }
 0x163   : > { %p3457_p3 = pnand %p3456_p10, %p3450_p1 }
 0x165   : > { %3460 = shalt.err (!%p3457_p3)
}
 0x166   : > { %p4951_p11 = scmp.ne.s32.totalorder %s4912_s25, 0  ;;  %s4952_s14 = scalar_lea.sflag [#allocation6], %s3967_s16 }
 0x167   : > { %s590_s11 = scalar_lea.vmem [#allocation10], %s3952_s18  ;;  %s2607_s5 = sshll.u32 %s3952_s18, 1 }
 0x168   : > { %2920 = dma.hbm_to_vmem [thread:$0]  (!%p4951_p11), %s4331_s3, 48, %s560_s12, %s4952_s14  }
 0x169   : > { %s597_s10 = sshll.u32 %s590_s11, 4  ;;  %s3461_s7 = scalar_lea.hbm %s4339_s27, 16  ;;  %s598_s10 = int_to_ptr.vmem [resolvable:$true] %s597_s10 }
 0x16a   : > { %p3462_p10 = scmp.ne.s32.totalorder %s4339_s27, %s3461_s7  ;;  %s3466_s9 = scalar_lea.hbm %s4949_s13, 32 }
 0x16b   : > { %p3467_p4 = scmp.lt.u32.totalorder %s4339_s27, %s4949_s13  ;;  %p3468_p7 = scmp.lt.u32.totalorder %s3466_s9, %s3461_s7 }
 0x16c   : > { %p3464_p12 = pnand %p3462_p10, %p4950_p6  ;;  %p3470_p8 = scmp.lt.u32.totalorder %s3461_s7, %s4339_s27 }
 0x16d   : > { %p3469_p13 = por %p3468_p7, %p3467_p4 }
 0x16e   : > { %p3465_p0 = pneg %p3464_p12 }
 0x16f   : > { %p3471_p5 = por %p3470_p8, %p3469_p13 }
 0x171   : > { %p3472_p1 = pnand %p3471_p5, %p3465_p0 }
 0x173   : > { %3475 = shalt.err (!%p3472_p1)
}
 0x174   : > { %s3476_s3 = scalar_lea.vmem %s598_s10, 16  ;;  %s3779_s12 = smov [#allocation10]  }
 0x175   : > { %p3477_p2 = scmp.ne.s32.totalorder %s598_s10, %s3476_s3  ;;  %s3481_s8 = sshll.u32 %s3779_s12, 4  ;;  %s3482_s8 = int_to_ptr.vmem [resolvable:$false] %s3481_s8 }
 0x176   : > { %s3483_s14 = scalar_lea.vmem %s3482_s8, 32  ;;  %p3484_p10 = scmp.lt.s32.totalorder %s598_s10, %s3482_s8 }
 0x177   : > { %p3479_p9 = pnand %p3477_p2, %p4950_p6  ;;  %p3485_p12 = scmp.lt.s32.totalorder %s3483_s14, %s3476_s3 }
 0x179   : > { %p3480_p3 = pneg %p3479_p9  ;;  %p3486_p11 = por %p3485_p12, %p3484_p10 }
 0x17b   : > { %p3487_p4 = pnand %p3486_p11, %p3480_p3 }
 0x17d   : > { %3490 = shalt.err (!%p3487_p4)
}
 0x17e   : > { %p4953_p7 = scmp.ne.s32.totalorder %s4912_s25, 0  ;;  %s4954_s11 = scalar_lea.sflag [#allocation9], %s3967_s16 }
 0x17f   : > { %s2716_s7 = sshll.u32 %s3753_s26, 5  ;;  %s629_s0 = scalar_lea.vmem [#allocation13], %s2607_s5 }
 0x180   : > { %2926 = dma.hbm_to_vmem [thread:$0]  (!%p4953_p7), %s4339_s27, 16, %s598_s10, %s4954_s11  }
 0x181   : > { %s637_s30 = sshll.u32 %s629_s0, 4  ;;  %s4955_s17 = sld [smem:[#allocation53_spill]]  ;;  %s638_s30 = int_to_ptr.vmem [resolvable:$true] %s637_s30 }
 0x187   : > { %s635_s3 = scalar_lea.hbm %s4955_s17, %s2716_s7  ;;  %s3496_s2 = scalar_lea.hbm %s4955_s17, 64 }
 0x188   : > { %s3491_s12 = scalar_lea.hbm %s635_s3, 32  ;;  %p3497_p8 = scmp.lt.u32.totalorder %s635_s3, %s4955_s17 }
 0x189   : > { %p3492_p11 = scmp.ne.s32.totalorder %s635_s3, %s3491_s12  ;;  %p3498_p5 = scmp.lt.u32.totalorder %s3496_s2, %s3491_s12 }
 0x18a   : > { %p3500_p2 = scmp.lt.u32.totalorder %s3491_s12, %s635_s3 }
 0x18b   : > { %p3494_p0 = pnand %p3492_p11, %p4950_p6  ;;  %p3499_p1 = por %p3498_p5, %p3497_p8 }
 0x18d   : > { %p3495_p13 = pneg %p3494_p0  ;;  %p3501_p9 = por %p3500_p2, %p3499_p1 }
 0x18f   : > { %p3502_p3 = pnand %p3501_p9, %p3495_p13 }
 0x191   : > { %3505 = shalt.err (!%p3502_p3)
}
 0x192   : > { %s3506_s10 = scalar_lea.vmem %s638_s30, 32  ;;  %s3780_s5 = smov [#allocation13]  }
 0x193   : > { %p3507_p10 = scmp.ne.s32.totalorder %s638_s30, %s3506_s10  ;;  %s3511_s11 = sshll.u32 %s3780_s5, 4  ;;  %s3512_s11 = int_to_ptr.vmem [resolvable:$false] %s3511_s11 }
 0x194   : > { %s3513_s7 = scalar_lea.vmem %s3512_s11, 64  ;;  %p3514_p11 = scmp.lt.s32.totalorder %s638_s30, %s3512_s11 }
 0x195   : > { %p3509_p12 = pnand %p3507_p10, %p4950_p6  ;;  %p3515_p0 = scmp.lt.s32.totalorder %s3513_s7, %s3506_s10 }
 0x197   : > { %p3510_p4 = pneg %p3509_p12  ;;  %p3516_p7 = por %p3515_p0, %p3514_p11 }
 0x199   : > { %p3517_p5 = pnand %p3516_p7, %p3510_p4 }
 0x19b   : > { %3520 = shalt.err (!%p3517_p5)
}
 0x19c   : > { %p4956_p8 = scmp.ne.s32.totalorder %s4912_s25, 0  ;;  %s4957_s13 = scalar_lea.sflag [#allocation12], %s3967_s16 }
 0x19d   : > { %s4958_s9 = sld [smem:[#allocation55_spill]]  ;;  %s668_s12 = scalar_lea.vmem [#allocation16], %s3952_s18 }
 0x19e   : > { %2932 = dma.hbm_to_vmem [thread:$0]  (!%p4956_p8), %s635_s3, 32, %s638_s30, %s4957_s13  }
 0x19f   : > { %s675_s8 = sshll.u32 %s668_s12, 4  ;;  %s4959_s10 = sld [smem:[#allocation57_spill]]  ;;  %s676_s8 = int_to_ptr.vmem [resolvable:$true] %s675_s8 }
 0x1a3   : > { %s4405_s24 = scalar_lea.hbm %s4958_s9, %s4117_s29  ;;  %s3526_s7 = scalar_lea.hbm %s4958_s9, 32 }
 0x1a4   : > { %s3521_s11 = scalar_lea.hbm %s4405_s24, 16  ;;  %p3527_p2 = scmp.lt.u32.totalorder %s4405_s24, %s4958_s9 }
 0x1a5   : > { %s4412_s5 = scalar_lea.hbm %s4959_s10, %s4117_s29  ;;  %p3522_p7 = scmp.ne.s32.totalorder %s4405_s24, %s3521_s11 }
 0x1a6   : > { %p3528_p9 = scmp.lt.u32.totalorder %s3526_s7, %s3521_s11  ;;  %p3530_p10 = scmp.lt.u32.totalorder %s3521_s11, %s4405_s24 }
 0x1a7   : > { %p3524_p13 = pnand %p3522_p7, %p4950_p6 }
 0x1a8   : > { %p3529_p3 = por %p3528_p9, %p3527_p2 }
 0x1a9   : > { %p3525_p1 = pneg %p3524_p13 }
 0x1aa   : > { %p3531_p12 = por %p3530_p10, %p3529_p3 }
 0x1ac   : > { %p3532_p4 = pnand %p3531_p12, %p3525_p1 }
 0x1ae   : > { %3535 = shalt.err (!%p3532_p4)
}
 0x1af   : > { %s3536_s0 = scalar_lea.vmem %s676_s8, 16  ;;  %s3781_s12 = smov [#allocation16]  }
 0x1b0   : > { %p3537_p11 = scmp.ne.s32.totalorder %s676_s8, %s3536_s0  ;;  %s3541_s14 = sshll.u32 %s3781_s12, 4  ;;  %s3542_s14 = int_to_ptr.vmem [resolvable:$false] %s3541_s14 }
 0x1b1   : > { %s3543_s27 = scalar_lea.vmem %s3542_s14, 32  ;;  %p3544_p7 = scmp.lt.s32.totalorder %s676_s8, %s3542_s14 }
 0x1b2   : > { %p3539_p0 = pnand %p3537_p11, %p4950_p6  ;;  %p3545_p13 = scmp.lt.s32.totalorder %s3543_s27, %s3536_s0 }
 0x1b4   : > { %p3540_p5 = pneg %p3539_p0  ;;  %p3546_p8 = por %p3545_p13, %p3544_p7 }
 0x1b6   : > { %p3547_p2 = pnand %p3546_p8, %p3540_p5 }
 0x1b8   : > { %3550 = shalt.err (!%p3547_p2)
}
 0x1b9   : > { %p4960_p9 = scmp.ne.s32.totalorder %s4912_s25, 0  ;;  %s4961_s11 = scalar_lea.sflag [#allocation15], %s3967_s16 }
 0x1ba   : > { %s702_s30 = scalar_lea.vmem [#allocation19], %s3952_s18  ;;  %s4962_s2 = sld [smem:[#allocation59_spill]] }
 0x1bb   : > { %2938 = dma.hbm_to_vmem [thread:$0]  (!%p4960_p9), %s4405_s24, 16, %s676_s8, %s4961_s11  }
 0x1bc   : > { %s709_s3 = sshll.u32 %s702_s30, 4  ;;  %s3551_s12 = scalar_lea.hbm %s4412_s5, 16  ;;  %s710_s3 = int_to_ptr.vmem [resolvable:$true] %s709_s3 }
 0x1bd   : > { %p3552_p8 = scmp.ne.s32.totalorder %s4412_s5, %s3551_s12  ;;  %s3556_s9 = scalar_lea.hbm %s4959_s10, 32 }
 0x1be   : > { %p3557_p10 = scmp.lt.u32.totalorder %s4412_s5, %s4959_s10  ;;  %p3558_p12 = scmp.lt.u32.totalorder %s3556_s9, %s3551_s12 }
 0x1bf   : > { %p3554_p1 = pnand %p3552_p8, %p4950_p6  ;;  %p3560_p11 = scmp.lt.u32.totalorder %s3551_s12, %s4412_s5 }
 0x1c0   : > { %s4438_s0 = scalar_lea.hbm %s4962_s2, %s4117_s29  ;;  %p3559_p4 = por %p3558_p12, %p3557_p10 }
 0x1c1   : > { %p3555_p3 = pneg %p3554_p1 }
 0x1c2   : > { %p3561_p0 = por %p3560_p11, %p3559_p4 }
 0x1c4   : > { %p3562_p5 = pnand %p3561_p0, %p3555_p3 }
 0x1c6   : > { %3565 = shalt.err (!%p3562_p5)
}
 0x1c7   : > { %s3566_s29 = scalar_lea.vmem %s710_s3, 16  ;;  %s3782_s24 = smov [#allocation19]  }
 0x1c8   : > { %p3567_p7 = scmp.ne.s32.totalorder %s710_s3, %s3566_s29  ;;  %s3571_s8 = sshll.u32 %s3782_s24, 4  ;;  %s3572_s8 = int_to_ptr.vmem [resolvable:$false] %s3571_s8 }
 0x1c9   : > { %s3573_s11 = scalar_lea.vmem %s3572_s8, 32  ;;  %p3574_p8 = scmp.lt.s32.totalorder %s710_s3, %s3572_s8 }
 0x1ca   : > { %p3569_p13 = pnand %p3567_p7, %p4950_p6  ;;  %p3575_p1 = scmp.lt.s32.totalorder %s3573_s11, %s3566_s29 }
 0x1cc   : > { %p3570_p2 = pneg %p3569_p13  ;;  %p3576_p9 = por %p3575_p1, %p3574_p8 }
 0x1ce   : > { %p3577_p10 = pnand %p3576_p9, %p3570_p2 }
 0x1d0   : > { %3580 = shalt.err (!%p3577_p10)
}
 0x1d1   : > { %p4963_p12 = scmp.ne.s32.totalorder %s4912_s25, 0  ;;  %s4964_s26 = scalar_lea.sflag [#allocation18], %s3967_s16 }
 0x1d2   : > { %s736_s17 = scalar_lea.vmem [#allocation22], %s3952_s18  ;;  %s3581_s30 = scalar_lea.hbm %s4438_s0, 16 }
 0x1d3   : > { %2944 = dma.hbm_to_vmem [thread:$0]  (!%p4963_p12), %s4412_s5, 16, %s710_s3, %s4964_s26  }
 0x1d4   : > { %s743_s9 = sshll.u32 %s736_s17, 4  ;;  %p3582_p3 = scmp.ne.s32.totalorder %s4438_s0, %s3581_s30  ;;  %s744_s9 = int_to_ptr.vmem [resolvable:$true] %s743_s9 }
 0x1d5   : > { %s3586_s12 = scalar_lea.hbm %s4962_s2, 32  ;;  %p3587_p11 = scmp.lt.u32.totalorder %s4438_s0, %s4962_s2 }
 0x1d6   : > { %p3584_p9 = pnand %p3582_p3, %p4950_p6  ;;  %p3588_p0 = scmp.lt.u32.totalorder %s3586_s12, %s3581_s30 }
 0x1d7   : > { %p3590_p7 = scmp.lt.u32.totalorder %s3581_s30, %s4438_s0 }
 0x1d8   : > { %p3585_p4 = pneg %p3584_p9  ;;  %p3589_p5 = por %p3588_p0, %p3587_p11 }
 0x1da   : > { %p3591_p13 = por %p3590_p7, %p3589_p5 }
 0x1dc   : > { %p3592_p2 = pnand %p3591_p13, %p3585_p4 }
 0x1de   : > { %3595 = shalt.err (!%p3592_p2)
}
 0x1df   : > { %s3596_s18 = scalar_lea.vmem %s744_s9, 16  ;;  %s3783_s5 = smov [#allocation22]  }
 0x1e0   : > { %p3597_p8 = scmp.ne.s32.totalorder %s744_s9, %s3596_s18  ;;  %s3601_s3 = sshll.u32 %s3783_s5, 4  ;;  %s3602_s3 = int_to_ptr.vmem [resolvable:$false] %s3601_s3 }
 0x1e1   : > { %s3603_s29 = scalar_lea.vmem %s3602_s3, 32  ;;  %p3604_p3 = scmp.lt.s32.totalorder %s744_s9, %s3602_s3 }
 0x1e2   : > { %p3599_p1 = pnand %p3597_p8, %p4950_p6  ;;  %p3605_p9 = scmp.lt.s32.totalorder %s3603_s29, %s3596_s18 }
 0x1e4   : > { %p3600_p10 = pneg %p3599_p1  ;;  %p3606_p12 = por %p3605_p9, %p3604_p3 }
 0x1e6   : > { %p3607_p0 = pnand %p3606_p12, %p3600_p10 }
 0x1e8   : > { %3610 = shalt.err (!%p3607_p0)
}
 0x1e9   : > { %p4965_p11 = scmp.ne.s32.totalorder %s4912_s25, 0  ;;  %s4966_s24 = scalar_lea.sflag [#allocation21], %s3967_s16 }
 0x1ea   : > { %s4967_s8 = sld [smem:[#allocation44_spill]] }
 0x1eb   : > { %2950 = dma.hbm_to_vmem [thread:$0]  (!%p4965_p11), %s4438_s0, 16, %s744_s9, %s4966_s24  }
 0x1f0   : > { %p4968_p4 = scmp.ne.s32.totalorder %s4967_s8, 0 }
 0x1f1   : > { %s4482_s15 = sand.u32 (!%p4968_p4), 1, %s3737_s22   ;;  %p4969_p6 = scmp.ne.s32.totalorder (!%p4968_p4), %s4937_s6, 0 }
 0x1f2   : > { %752 = sbr.rel (%p4968_p4) target bundleno = 3854 (0xf0e), region = 80  ;;  %s2619_s11 = sshll.u32 (!%p4968_p4), %s4482_s15, 3 }
 0x1f3   : > { %s755_s26 = scalar_lea.sflag (!%p4968_p4), [#allocation3], %s4482_s15  ;;  %s4488_s17 = scalar_lea.vmem (!%p4968_p4), [#allocation2], %s2619_s11 }
 0x1f9   : > { %3684 = dma.done.wait (%p4969_p6), %s755_s26, 128  }
 0x1fa   : > { %3686 = vsyncadd (%p4969_p6), %s755_s26, 4294967168  ;;  %s4970_s25 = sld [smem:[#allocation42_spill]]  ;;  %s4972_s0 = sld [smem:[#allocation43_spill]] }
 0x1fb   : > { %s4971_s16 = sld [smem:[#allocation36_spill]] }
 0x200   : > { %s4495_s9 = sand.u32 1, %s4970_s25   ;;  %p4973_p12 = scmp.ne.s32.totalorder %s4972_s0, 0 }
 0x201   : > { %s4498_s30 = sand.u32 1, %s4971_s16   ;;  %s764_s13 = scalar_lea.sflag [#allocation6], %s4495_s9 }
 0x202   : > { %s2866_s7 = smul.u32 192, %s4498_s30 }
 0x204   : > { %s4502_s12 = scalar_lea.vmem [#allocation5], %s2866_s7 }
 0x205   : > { %3688 = dma.done.wait (%p4973_p12), %s764_s13, 3120  }
 0x206   : > { %3690 = vsyncadd (%p4973_p12), %s764_s13, 4294964176  ;;  %s2867_s6 = smul.u32 3, %s4498_s30  ;;  %s2620_s14 = sshll.u32 %s4498_s30, 6 }
 0x207   : > { %s782_s18 = scalar_lea.sflag [#allocation9], %s4495_s9  ;;  %s4513_s5 = scalar_lea.vmem [#allocation8], %s2620_s14 }
 0x208   : > { %s4510_s27 = scalar_lea.vmem [#allocation7], %s2867_s6 }
 0x209   : > { %3692 = dma.done.wait (%p4973_p12), %s782_s18, 1040  }
 0x20a   : > { %3694 = vsyncadd (%p4973_p12), %s782_s18, 4294966256  ;;  %s2621_s3 = sshll.u32 %s4498_s30, 7  ;;  %s793_s29 = scalar_lea.vmem [#allocation10], %s4498_s30 }
 0x20b   : > { %s799_s24 = scalar_lea.sflag [#allocation12], %s4495_s9  ;;  %s4522_s8 = scalar_lea.vmem [#allocation11], %s2621_s3 }
 0x20c   : > { %3696 = dma.done.wait (%p4973_p12), %s799_s24, 2080  }
 0x20d   : > { %3698 = vsyncadd (%p4973_p12), %s799_s24, 4294965216  ;;  %s2622_s26 = sshll.u32 %s4498_s30, 1  ;;  %s817_s7 = scalar_lea.sflag [#allocation15], %s4495_s9 }
 0x20e   : > { %s4529_s16 = scalar_lea.vmem [#allocation13], %s2622_s26  ;;  %s4532_s13 = scalar_lea.vmem [#allocation14], %s2621_s3 }
 0x20f   : > { %3700 = dma.done.wait (%p4973_p12), %s817_s7, 2064  }
 0x210   : > { %3702 = vsyncadd (%p4973_p12), %s817_s7, 4294965232  ;;  %s834_s14 = scalar_lea.sflag [#allocation18], %s4495_s9  ;;  %s836_s18 = scalar_lea.vmem [#allocation17], %s4498_s30 }
 0x211   : > { %3704 = dma.done.wait (%p4973_p12), %s834_s14, 32  }
 0x212   : > { %3706 = vsyncadd (%p4973_p12), %s834_s14, 4294967264  ;;  %s844_s3 = scalar_lea.vmem [#allocation19], %s4498_s30  ;;  %s850_s24 = scalar_lea.sflag [#allocation21], %s4495_s9 }
 0x213   : > { %s852_s26 = scalar_lea.vmem [#allocation20], %s4498_s30 }
 0x214   : > { %3708 = dma.done.wait (%p4973_p12), %s850_s24, 32  }
 0x215   : > { %3710 = vsyncadd (%p4973_p12), %s850_s24, 4294967264  ;;  %s860_s7 = scalar_lea.vmem [#allocation22], %s4498_s30  ;;  %p4974_p5 = scmp.eq.s32.totalorder %s4970_s25, 0 }
 0x217   : > { %3712 = dma.done.wait (%p4974_p5), [#allocation24], 32   ;;  %p4975_p7 = pmov %p4974_p5 }
 0x218   : > { %s4559_s14 = scalar_lea.vmem [#allocation26], %s2619_s11  ;;  %s4976_s6 = sld [smem:[#allocation38_spill]] }
 0x219   : > { %3714 = vsyncadd (%p4975_p7), [#allocation24], 4294967264 }
 0x21e   : > { %p2627_p13 = scmp.ne.s32.totalorder %s4976_s6, 0 }
 0x21f   : > { %v974_v0 = vld [vmem:[%s4488_s17] sm:$0xff] (!%p2627_p13) }
 0x220   : > { %973 = sbr.rel (%p2627_p13) target bundleno = 551 (0x227), region = 144  ;;  %975 = vst [vmem:[%s4559_s14] sm:$0xff] (!%p2627_p13), %v974_v0 }
 0x227 PF: > { %v3063_v1 = vld [vmem:[%s4502_s12 + $0x4] ss:$12 sps:$4 sm:$0xff]   ;;  %v3065_v2 = vld [vmem:[%s4502_s12] ss:$12 sps:$4 sm:$0xff]   ;;  %v3784_v3 = vmov 0   ;;  %v3785_v4 = vmov 0.0   ;;  %v1012_v29 = vlaneseq }
 0x228   : > { %1187 = vmatprep.mubr.bf16.mxu0 %v3784_v3  ;;  %2774 = vmatprep.subr.bf16.mxu1 %v3785_v4  ;;  %v3066_v5 = vld [vmem:[%s4502_s12 + $0x1c] ss:$12 sps:$4 sm:$0xff]   ;;  %v3068_v6 = vld [vmem:[%s4502_s12 + $0x18] ss:$12 sps:$4 sm:$0xff]   ;;  %v3069_v7 = vld [vmem:[%s4502_s12 + $0x34] ss:$12 sps:$4 sm:$0xff]  }
 0x229   : > { %1155 = vmatprep.subr.bf16.mxu0 %v3063_v1  ;;  %v3071_v8 = vld [vmem:[%s4502_s12 + $0x30] ss:$12 sps:$4 sm:$0xff]   ;;  %v3072_v9 = vld [vmem:[%s4502_s12 + $0x4c] ss:$12 sps:$4 sm:$0xff]   ;;  %v3074_v10 = vld [vmem:[%s4502_s12 + $0x48] ss:$12 sps:$4 sm:$0xff]  }
 0x22a   : > { %1156 = vmatpush1.bf16.msra.mxu0 %v3065_v2  ;;  %v3087_v11 = vld [vmem:[%s4502_s12 + $0x8] ss:$12 sps:$4 sm:$0xff]   ;;  %v3075_v12 = vld [vmem:[%s4502_s12 + $0x64] ss:$12 sps:$4 sm:$0xff]   ;;  %v3088_v13 = vld [vmem:[%s4502_s12 + $0x20] ss:$12 sps:$4 sm:$0xff]  }
 0x22b   : > { %1157 = vmatprep.subr.bf16.mxu0 %v3066_v5  ;;  %2775 = vmatpush3.bf16.msra.mxu1 %v3087_v11  ;;  %v3077_v14 = vld [vmem:[%s4502_s12 + $0x60] ss:$12 sps:$4 sm:$0xff]   ;;  %v3078_v15 = vld [vmem:[%s4502_s12 + $0x7c] ss:$12 sps:$4 sm:$0xff]   ;;  %v3080_v16 = vld [vmem:[%s4502_s12 + $0x78] ss:$12 sps:$4 sm:$0xff]  }
 0x22c   : > { %2776 = vmatprep.subr.bf16.mxu1 %v3785_v4  ;;  %v3089_v17 = vld [vmem:[%s4502_s12 + $0x38] ss:$12 sps:$4 sm:$0xff]   ;;  %v3081_v18 = vld [vmem:[%s4502_s12 + $0x94] ss:$12 sps:$4 sm:$0xff]   ;;  %v3090_v19 = vld [vmem:[%s4502_s12 + $0x50] ss:$12 sps:$4 sm:$0xff]  }
 0x22d   : > { %v3083_v20 = vld [vmem:[%s4502_s12 + $0x90] ss:$12 sps:$4 sm:$0xff]   ;;  %v3084_v21 = vld [vmem:[%s4502_s12 + $0xac] ss:$12 sps:$4 sm:$0xff]   ;;  %v3091_v22 = vld [vmem:[%s4502_s12 + $0x68] ss:$12 sps:$4 sm:$0xff]  }
 0x22e   : > { %1158 = vmatpush1.bf16.msra.mxu0 %v3068_v6  ;;  %v3086_v23 = vld [vmem:[%s4502_s12 + $0xa8] ss:$12 sps:$4 sm:$0xff]   ;;  %v3092_v25 = vld [vmem:[%s4502_s12 + $0x80] ss:$12 sps:$4 sm:$0xff]   ;;  %v3093_v27 = vld [vmem:[%s4502_s12 + $0x98] ss:$12 sps:$4 sm:$0xff]  }
 0x22f   : > { %1159 = vmatprep.subr.bf16.mxu0 %v3069_v7  ;;  %2777 = vmatpush3.bf16.msra.mxu1 %v3088_v13  ;;  %v4591_v24 = vld [vmem:[%s4559_s14] sm:$0xff]  ;;  %vm3786_vm0 = vmmov 0   ;;  %v4610_v30 = vshrl.u32 %v1012_v29, 7  ;;  %vm1239_vm1 = vcmask 261120   ;;  %s3787_s11 = smov 96   ;;  %s3788_s17 = smov 64  }
 0x230   : > { %2778 = vmatprep.subr.bf16.mxu1 %v3785_v4  ;;  %v977_v26 = vpack.c.bf16 %v4591_v24, %v4591_v24  ;;  %v3094_v28 = vld [vmem:[%s4502_s12 + $0xb0] ss:$12 sps:$4 sm:$0xff]   ;;  %2790 = vmatprep.mubr.msk.bf16.mxu1 %vm3786_vm0, %v3785_v4  ;;  %v1010_v32 = vld [vmem:[%s4510_s27] sm:$0x7]  ;;  %s3789_s25 = smov 32   ;;  %vm1302_vm2 = vcmask 1043456  }
 0x231   : > { %v1018_v31 = vsub.s32 1, %v4610_v30  ;;  %v1014_v33 = vsub.s32 0, %v4610_v30  ;;  %v1022_v45 = vsub.s32 2, %v4610_v30  ;;  %vm1286_vm3 = vcmask 64512   ;;  %s4977_s0 = scalar_lea.vmem [#allocation16], %s4498_s30  ;;  %s4978_s9 = sld [smem:[#allocation38_spill]] }
 0x232   : > { %1160 = vmatpush1.bf16.msra.mxu0 %v3071_v8  ;;  %vm1695_vm4 = vcmask 523264   ;;  %vm1698_vm5 = vcmask 785408  }
 0x233   : > { %1161 = vmatprep.subr.bf16.mxu0 %v3072_v9  ;;  %2779 = vmatpush3.bf16.msra.mxu1 %v3089_v17  ;;  %v1019_v34 = vrot.slane %v1010_v32, %v1018_v31  ;;  %v1015_v35 = vrot.slane %v1010_v32, %v1014_v33  ;;  %v1023_v46 = vrot.slane %v1010_v32, %v1022_v45 }
 0x234   : > { %2780 = vmatprep.subr.bf16.mxu1 %v3785_v4 }
 0x236   : > { %1162 = vmatpush1.bf16.msra.mxu0 %v3074_v10 }
 0x237   : > { %1163 = vmatprep.subr.bf16.mxu0 %v3075_v12  ;;  %2781 = vmatpush3.bf16.msra.mxu1 %v3090_v19  ;;  %p2706_p2 = scmp.ge.s32.totalorder %s4978_s9, 1 }
 0x238   : > { %2782 = vmatprep.subr.bf16.mxu1 %v3785_v4 }
 0x23a   : > { %1164 = vmatpush1.bf16.msra.mxu0 %v3077_v14 }
 0x23b   : > { %1165 = vmatprep.subr.bf16.mxu0 %v3078_v15  ;;  %2783 = vmatpush3.bf16.msra.mxu1 %v3091_v22 }
 0x23c   : > { %2784 = vmatprep.subr.bf16.mxu1 %v3785_v4 }
 0x23e   : > { %1166 = vmatpush1.bf16.msra.mxu0 %v3080_v16 }
 0x23f   : > { %1167 = vmatprep.subr.bf16.mxu0 %v3081_v18  ;;  %2785 = vmatpush3.bf16.msra.mxu1 %v3092_v25 }
 0x240   : > { %2786 = vmatprep.subr.bf16.mxu1 %v3785_v4 }
 0x242   : > { %1168 = vmatpush1.bf16.msra.mxu0 %v3083_v20 }
 0x243   : > { %1169 = vmatprep.subr.bf16.mxu0 %v3084_v21  ;;  %2787 = vmatpush3.bf16.msra.mxu1 %v3093_v27 }
 0x244   : > { %2788 = vmatprep.subr.bf16.mxu1 %v3785_v4 }
 0x246   : > { %1170 = vmatpush1.bf16.msra.mxu0 %v3086_v23 }
 0x247   : > { %2818 = vmatprep.subr.bf16.mxu0 %v3785_v4  ;;  %2789 = vmatpush3.bf16.msra.mxu1 %v3094_v28 }
 0x248   : > { %2794 = vmatprep.subr.bf16.mxu1 %v3785_v4 }
 0x249   : > { %1188 = vmatmul.mubr.bf16.vlgmr.msra.gmra.mrb[0].mxu0 %v977_v26 }
 0x24a   : > { %2820 = vmatprep.mubr.msk.bf16.mxu0 %vm3786_vm0, %v3785_v4  ;;  %2791 = vmatmul.mubr.bf16.vlgmr.msra.gmra.mrb[0].mxu1 %v977_v26 }
 0x24b   : > { %2796 = vmatprep.mubr.msk.bf16.mxu1 %vm3786_vm0, %v3785_v4 }
 0x31c   : > { %v1189_v36 = vpop.f32.mrb[0].mxu0 }
 0x31d   : > { %v1191_v37 = vpop.f32.mrb[1].mxu0  ;;  %v1190_v41 = vadd.f32 %v1189_v36, %v1015_v35  ;;  %v1230_v47 = vpop.f32.mrb[0].mxu1 }
 0x31e   : > { %v1192_v38 = vadd.f32 %v1191_v37, %v1019_v34  ;;  %v1193_v39 = vpop.f32.mrb[2].mxu0  ;;  %v1231_v48 = vadd.f32 %v1230_v47, %v1023_v46  ;;  %v2792_v49 = vpop.f32.mrb[1].mxu1 }
 0x31f   : > { %v1194_v40 = vpop.f32.mrb[3].mxu0  ;;  %v1236_v44 = vpack.c.bf16 %v1190_v41, %v1190_v41  ;;  %v1233_v50 = vpop.f32.mrb[2].mxu1 }
 0x320   : > { %v1237_v42 = vpack.c.bf16 %v1192_v38, %v1192_v38  ;;  %v4630_v51 = vpack.c.bf16 %v1231_v48, %v1231_v48  ;;  %v2793_v52 = vpop.f32.mrb[3].mxu1 }
 0x322   : > { %1351 = vrot.lane.b32.xlu1 %v1237_v42, %s3787_s11  ;;  %v1244_v43 = vsel %vm1239_vm1, %v1237_v42, 0  ;;  %v1304_v53 = vsel %vm1302_vm2, %v4630_v51, 0 }
 0x323   : > { %2795 = vmatpush3.bf16.xpose.msra.mxu1 %v1244_v43 }
 0x324   : > { %2800 = vmatprep.subr.bf16.mxu1 %v3785_v4 }
 0x326   : > { %1348 = vrot.lane.b32.xlu1 %v1236_v44, %s3787_s11 }
 0x32a   : > { %1461 = vrot.lane.b32.xlu1 %v1236_v44, %s3788_s17  ;;  %2797 = vmatmul.mubr.msk.bf16.vlgmr.msra.gmra.mrb[4].mxu1 %vm1239_vm1, %v1236_v44 }
 0x32b   : > { %2802 = vmatprep.mubr.msk.bf16.mxu1 %vm3786_vm0, %v3785_v4  ;;  %2801 = vmatpush3.bf16.msra.mxu1 %v1304_v53 }
 0x32c   : > { %2806 = vmatprep.subr.bf16.mxu1 %v3785_v4 }
 0x32e   : > { %1574 = vrot.lane.b32.xlu1 %v1237_v42, %s3789_s25 }
 0x332   : > { %1572 = vrot.lane.b32.xlu1 %v1236_v44, %s3789_s25 }
 0x394   : > { %v1352_v0 = vpop.permute.xlu1 %1351 }
 0x395   : > { %v1357_v13 = vsel %vm1239_vm1, %v1352_v0, 0 }
 0x398   : > { %v1349_v1 = vpop.permute.xlu1 %1348 }
 0x39c   : > { %v1462_v5 = vpop.permute.xlu1 %1461 }
 0x3a0   : > { %v1575_v8 = vpop.permute.xlu1 %1574 }
 0x3a1   : > { %v1580_v11 = vsel %vm1239_vm1, %v1575_v8, 0 }
 0x3a4   : > { %v1573_v14 = vpop.permute.xlu1 %1572 }
 0x3fd   : > { %v1280_v54 = vpop.f32.mrb[4].mxu1 }
 0x3fe   : > { %v2798_v55 = vpop.f32.mrb[5].mxu1  ;;  %v1287_v56 = vsel %vm1286_vm3, %v1280_v54, -inf }
 0x3ff   : > { %1288 = vmax.xlane.f32.xlu0 %v1287_v56  ;;  %v1283_v57 = vpop.f32.mrb[6].mxu1 }
 0x400   : > { %v2799_v58 = vpop.f32.mrb[7].mxu1 }
 0x48c   : > { %v1289_v59 = vpop.xlane.xlu0 %1288 }
 0x48d   : > { %v1290_v60 = vsub.f32 %v1280_v54, %v1289_v59 }
 0x48f   : > { %v1291_v61 = vmul.f32 1.442695, %v1290_v60 }
 0x491   : > { %3143 = vpow2.f32 %v1291_v61 }
 0x49b   : > { %v3144_v62 = vpop.eup %3143 }
 0x49c   : > { %v1293_v63 = vsel %vm1286_vm3, %v3144_v62, 0.0 }
 0x49d   : > { %1294 = vadd.xlane.f32.xlu0 %v1293_v63 }
 0x4b3   : > { %1463 = vrot.lane.b32.xlu0 %v1237_v42, %s3788_s17 }
 0x52a   : > { %v1295_v2 = vpop.xlane.xlu0 %1294 }
 0x52b   : > { %3145 = vrcp.f32 %v1295_v2 }
 0x52e   : > { %v1464_v6 = vpop.permute.xlu0 %1463 }
 0x52f   : > { %v1469_v7 = vsel %vm1239_vm1, %v1464_v6, 0 }
 0x530   : > { %2819 = vmatpush3.bf16.xpose.msra.mxu0 %v1469_v7 }
 0x531   : > { %2830 = vmatprep.subr.bf16.mxu0 %v3785_v4 }
 0x535   : > { %v3146_v9 = vpop.eup %3145 }
 0x536   : > { %v1297_v10 = vmul.f32 %v3146_v9, %v3144_v62  ;;  %v3095_v9 = vld [vmem:[%s4513_s5] sm:$0xff]  }
 0x537   : > { %2821 = vmatmul.mubr.msk.bf16.vlgmr.msra.gmra.mrb[4].mxu0 %vm1239_vm1, %v1462_v5 }
 0x538   : > { %2831 = vmatpush3.bf16.xpose.msra.mxu0 %v1580_v11  ;;  %v1298_v12 = vpack.c.bf16 %v1297_v10, %v1297_v10  ;;  %2832 = vmatprep.mubr.msk.bf16.mxu0 %vm3786_vm0, %v3785_v4  ;;  %v3096_v10 = vld [vmem:[%s4513_s5 + $0x8] sm:$0xff]   ;;  %v3097_v11 = vld [vmem:[%s4513_s5 + $0x10] sm:$0xff]  }
 0x539   : > { %2842 = vmatprep.subr.bf16.mxu0 %v3785_v4 }
 0x53a   : > { %2803 = vmatmul.mubr.msk.bf16.vlgmr.msra.gmra.mrb[8].mxu1 %vm1286_vm3, %v1298_v12  ;;  %v3098_v12 = vld [vmem:[%s4513_s5 + $0x18] sm:$0xff]  }
 0x53b   : > { %2807 = vmatpush3.bf16.xpose.msra.mxu1 %v1357_v13  ;;  %2808 = vmatprep.mubr.msk.bf16.mxu1 %vm3786_vm0, %v3785_v4  ;;  %v3099_v13 = vld [vmem:[%s4513_s5 + $0x20] sm:$0xff]  }
 0x53c   : > { %2812 = vmatprep.subr.bf16.mxu1 %v3785_v4 }
 0x53f   : > { %2833 = vmatmul.mubr.msk.bf16.vlgmr.msra.gmra.mrb[8].mxu0 %vm1239_vm1, %v1573_v14  ;;  %v3101_v14 = vld [vmem:[%s4513_s5 + $0x30] sm:$0xff]  }
 0x540   : > { %2858 = vmatprep.mubr.msk.bf16.mxu0 %vm3786_vm0, %v3785_v4  ;;  %2843 = vmatpush3.bf16.msra.mxu0 %v3095_v9  ;;  %v3131_v9 = vld [vmem:[%s4532_s13 + $0x50] sm:$0xff]  }
 0x541   : > { %2844 = vmatprep.subr.bf16.mxu0 %v3785_v4 }
 0x542   : > { %2809 = vmatmul.mubr.msk.bf16.vlgmr.msra.gmra.mrb[12].mxu1 %vm1239_vm1, %v1349_v1 }
 0x543   : > { %2814 = vmatprep.mubr.msk.bf16.mxu1 %vm3786_vm0, %v3785_v4 }
 0x544   : > { %2845 = vmatpush3.bf16.msra.mxu0 %v3096_v10  ;;  %v3132_v10 = vld [vmem:[%s4532_s13 + $0x10] sm:$0xff]  }
 0x545   : > { %2846 = vmatprep.subr.bf16.mxu0 %v3785_v4 }
 0x548   : > { %2847 = vmatpush3.bf16.msra.mxu0 %v3097_v11  ;;  %v3133_v11 = vld [vmem:[%s4532_s13 + $0x58] sm:$0xff]  }
 0x549   : > { %2848 = vmatprep.subr.bf16.mxu0 %v3785_v4 }
 0x54c   : > { %2849 = vmatpush3.bf16.msra.mxu0 %v3098_v12  ;;  %v3134_v12 = vld [vmem:[%s4532_s13 + $0x18] sm:$0xff]  }
 0x54d   : > { %2850 = vmatprep.subr.bf16.mxu0 %v3785_v4 }
 0x550   : > { %2851 = vmatpush3.bf16.msra.mxu0 %v3099_v13  ;;  %v3135_v13 = vld [vmem:[%s4532_s13 + $0x60] sm:$0xff]  }
 0x551   : > { %2852 = vmatprep.subr.bf16.mxu0 %v3785_v4 }
 0x60a   : > { %v1505_v15 = vpop.f32.mrb[4].mxu0 }
 0x60b   : > { %v2822_v16 = vpop.f32.mrb[5].mxu0  ;;  %v1511_v17 = vsel %vm1286_vm3, %v1505_v15, -inf }
 0x60c   : > { %1512 = vmax.xlane.f32.xlu0 %v1511_v17  ;;  %v1508_v18 = vpop.f32.mrb[6].mxu0  ;;  %v3102_v16 = vld [vmem:[%s4513_s5 + $0x38] sm:$0xff]  }
 0x60d   : > { %v4657_v19 = vpop.f32.mrb[8].mxu1  ;;  %v2823_v20 = vpop.f32.mrb[7].mxu0 }
 0x60e   : > { %v2804_v21 = vpop.f32.mrb[9].mxu1 }
 0x60f   : > { %v1343_v22 = vpop.f32.mrb[10].mxu1 }
 0x610   : > { %v2805_v23 = vpop.f32.mrb[11].mxu1 }
 0x612   : > { %v1616_v25 = vpop.f32.mrb[8].mxu0 }
 0x613   : > { %v2834_v26 = vpop.f32.mrb[9].mxu0  ;;  %v1622_v37 = vsel %vm1286_vm3, %v1616_v25, -inf }
 0x614   : > { %v1619_v27 = vpop.f32.mrb[10].mxu0 }
 0x615   : > { %v1393_v28 = vpop.f32.mrb[12].mxu1  ;;  %v2835_v29 = vpop.f32.mrb[11].mxu0 }
 0x616   : > { %v2810_v32 = vpop.f32.mrb[13].mxu1  ;;  %v1399_v34 = vsel %vm1286_vm3, %v1393_v28, -inf }
 0x617   : > { %1400 = vmax.xlane.f32.xlu1 %v1399_v34  ;;  %v1396_v35 = vpop.f32.mrb[14].mxu1 }
 0x618   : > { %v2811_v36 = vpop.f32.mrb[15].mxu1 }
 0x619   : > { %v1346_v36 = vpack.c.bf16 %v4657_v19, %v4657_v19 }
 0x61b   : > { %1623 = vmax.xlane.f32.xlu1 %v1622_v37 }
 0x699   : > { %v1513_v38 = vpop.xlane.xlu0 %1512 }
 0x69a   : > { %v1514_v39 = vsub.f32 %v1505_v15, %v1513_v38 }
 0x69c   : > { %v1515_v40 = vmul.f32 1.442695, %v1514_v39 }
 0x69e   : > { %3147 = vpow2.f32 %v1515_v40 }
 0x6a4   : > { %v1401_v41 = vpop.xlane.xlu1 %1400 }
 0x6a5   : > { %v1402_v42 = vsub.f32 %v1393_v28, %v1401_v41 }
 0x6a7   : > { %v1403_v47 = vmul.f32 1.442695, %v1402_v42  ;;  %v2660_v42 = vld [vmem:[%s793_s29] ss:$0 sm:$0xff] }
 0x6a8   : > { %v3148_v43 = vpop.eup %3147  ;;  %v1624_v44 = vpop.xlane.xlu1 %1623 }
 0x6a9   : > { %v1625_v45 = vsub.f32 %v1616_v25, %v1624_v44  ;;  %v1517_v46 = vsel %vm1286_vm3, %v3148_v43, 0.0 }
 0x6aa   : > { %1518 = vadd.xlane.f32.xlu0 %v1517_v46 }
 0x6ab   : > { %v1626_v48 = vmul.f32 1.442695, %v1625_v45 }
 0x6ad   : > { %3149 = vpow2.f32 %v1626_v48  ;;  %v3103_v48 = vld [vmem:[%s4522_s8] ss:$8 sps:$4 sm:$0xff]  }
 0x6ae   : > { %3151 = vpow2.f32 %v1403_v47 }
 0x6b7   : > { %v3150_v49 = vpop.eup %3149 }
 0x6b8   : > { %v1628_v50 = vsel %vm1286_vm3, %v3150_v49, 0.0  ;;  %v3152_v52 = vpop.eup %3151 }
 0x6b9   : > { %1629 = vadd.xlane.f32.xlu1 %v1628_v50  ;;  %v1405_v53 = vsel %vm1286_vm3, %v3152_v52, 0.0  ;;  %v3108_v50 = vld [vmem:[%s4522_s8 + $0x14] ss:$8 sps:$4 sm:$0xff]  }
 0x6bd   : > { %1406 = vadd.xlane.f32.xlu1 %v1405_v53  ;;  %v3111_v53 = vld [vmem:[%s4522_s8 + $0x24] ss:$8 sps:$4 sm:$0xff]  }
 0x6c0   : > { %1412 = vrot.lane.b32.xlu0 %v4630_v51, %s3787_s11 }
 0x6ce   : > { %1523 = vrot.lane.b32.xlu1 %v4630_v51, %s3788_s17 }
 0x6d2   : > { %1634 = vrot.lane.b32.xlu1 %v4630_v51, %s3789_s25 }
 0x737   : > { %v1519_v54 = vpop.xlane.xlu0 %1518 }
 0x73b   : > { %v1413_v55 = vpop.permute.xlu0 %1412 }
 0x73c   : > { %v1418_v56 = vsel %vm1302_vm2, %v1413_v55, 0 }
 0x73d   : > { %2813 = vmatpush3.bf16.msra.mxu1 %v1418_v56 }
 0x73e   : > { %2824 = vmatprep.subr.bf16.mxu1 %v3785_v4 }
 0x746   : > { %v1630_v57 = vpop.xlane.xlu1 %1629 }
 0x74a   : > { %v1407_v58 = vpop.xlane.xlu1 %1406 }
 0x74b   : > { %3153 = vrcp.f32 %v1407_v58  ;;  %v3114_v58 = vld [vmem:[%s4522_s8 + $0x34] ss:$8 sps:$4 sm:$0xff]  }
 0x74c   : > { %3155 = vrcp.f32 %v1519_v54  ;;  %v3109_v54 = vld [vmem:[%s4522_s8 + $0x20] ss:$8 sps:$4 sm:$0xff]  }
 0x74d   : > { %3157 = vrcp.f32 %v1630_v57 }
 0x74e   : > { %v1524_v61 = vpop.permute.xlu1 %1523 }
 0x74f   : > { %v1529_v0 = vsel %vm1302_vm2, %v1524_v61, 0  ;;  %v3115_v61 = vld [vmem:[%s4522_s8 + $0x40] ss:$8 sps:$4 sm:$0xff]  }
 0x752   : > { %v1635_v1 = vpop.permute.xlu1 %1634 }
 0x753   : > { %v1640_v6 = vsel %vm1302_vm2, %v1635_v1, 0  ;;  %v3126_v1 = vld [vmem:[%s4522_s8 + $0x74] ss:$8 sps:$4 sm:$0xff]  }
 0x755   : > { %v3154_v59 = vpop.eup %3153 }
 0x756   : > { %v1409_v60 = vmul.f32 %v3154_v59, %v3152_v52  ;;  %v3156_v63 = vpop.eup %3155  ;;  %v3106_v52 = vld [vmem:[%s4522_s8 + $0x10] ss:$8 sps:$4 sm:$0xff]  }
 0x757   : > { %v1521_v51 = vmul.f32 %v3156_v63, %v3148_v43  ;;  %v3158_v5 = vpop.eup %3157  ;;  %v3112_v59 = vld [vmem:[%s4522_s8 + $0x30] ss:$8 sps:$4 sm:$0xff]  }
 0x758   : > { %v1410_v62 = vpack.c.bf16 %v1409_v60, %v1409_v60  ;;  %v1632_v7 = vmul.f32 %v3158_v5, %v3150_v49  ;;  %v3105_v49 = vld [vmem:[%s4522_s8 + $0x4] ss:$8 sps:$4 sm:$0xff]   ;;  %v3118_v63 = vld [vmem:[%s4522_s8 + $0x50] ss:$8 sps:$4 sm:$0xff]  }
 0x759   : > { %v1522_v2 = vpack.c.bf16 %v1521_v51, %v1521_v51  ;;  %v3117_v60 = vld [vmem:[%s4522_s8 + $0x44] ss:$8 sps:$4 sm:$0xff]   ;;  %v3121_v51 = vld [vmem:[%s4522_s8 + $0x60] ss:$8 sps:$4 sm:$0xff]  }
 0x75a   : > { %2815 = vmatmul.mubr.msk.bf16.vlgmr.msra.gmra.mrb[16].mxu1 %vm1286_vm3, %v1410_v62  ;;  %v1633_v8 = vpack.c.bf16 %v1632_v7, %v1632_v7  ;;  %v3120_v62 = vld [vmem:[%s4522_s8 + $0x54] ss:$8 sps:$4 sm:$0xff]   ;;  %v3127_v5 = vld [vmem:[%s4532_s13 + $0x40] sm:$0xff]   ;;  %v3129_v7 = vld [vmem:[%s4532_s13 + $0x48] sm:$0xff]  }
 0x75b   : > { %2825 = vmatpush3.bf16.msra.mxu1 %v1529_v0  ;;  %2826 = vmatprep.mubr.msk.bf16.mxu1 %vm3786_vm0, %v3785_v4  ;;  %v3123_v0 = vld [vmem:[%s4522_s8 + $0x64] ss:$8 sps:$4 sm:$0xff]  }
 0x75c   : > { %2836 = vmatprep.subr.bf16.mxu1 %v3785_v4 }
 0x762   : > { %2827 = vmatmul.mubr.msk.bf16.vlgmr.msra.gmra.mrb[20].mxu1 %vm1286_vm3, %v1522_v2  ;;  %v3124_v2 = vld [vmem:[%s4522_s8 + $0x70] ss:$8 sps:$4 sm:$0xff]  }
 0x763   : > { %2837 = vmatpush3.bf16.msra.mxu1 %v1640_v6  ;;  %2838 = vmatprep.mubr.msk.bf16.mxu1 %vm3786_vm0, %v3785_v4  ;;  %v3128_v6 = vld [vmem:[%s4532_s13] sm:$0xff]  }
 0x764   : > { %1951 = vmatprep.subr.bf16.mxu1 %v3105_v49 }
 0x76a   : > { %2839 = vmatmul.mubr.msk.bf16.vlgmr.msra.gmra.mrb[24].mxu1 %vm1286_vm3, %v1633_v8  ;;  %v3130_v8 = vld [vmem:[%s4532_s13 + $0x8] sm:$0xff]  }
 0x76b   : > { %1983 = vmatprep.mubr.bf16.mxu1 %v3784_v3  ;;  %v3100_v3 = vld [vmem:[%s4513_s5 + $0x28] sm:$0xff]   ;;  %1952 = vmatpush1.bf16.msra.mxu1 %v3103_v48 }
 0x76c   : > { %2853 = vmatpush3.bf16.msra.mxu0 %v3100_v3  ;;  %1953 = vmatprep.subr.bf16.mxu1 %v3108_v50  ;;  %v3136_v3 = vld [vmem:[%s4532_s13 + $0x20] sm:$0xff]  }
 0x76d   : > { %2854 = vmatprep.subr.bf16.mxu0 %v3785_v4 }
 0x76f   : > { %1954 = vmatpush1.bf16.msra.mxu1 %v3106_v52 }
 0x770   : > { %2855 = vmatpush3.bf16.msra.mxu0 %v3101_v14  ;;  %1955 = vmatprep.subr.bf16.mxu1 %v3111_v53  ;;  %v3137_v14 = vld [vmem:[%s4532_s13 + $0x68] sm:$0xff]  }
 0x771   : > { %2856 = vmatprep.subr.bf16.mxu0 %v3785_v4 }
 0x773   : > { %1956 = vmatpush1.bf16.msra.mxu1 %v3109_v54 }
 0x774   : > { %2857 = vmatpush3.bf16.msra.mxu0 %v3102_v16  ;;  %1957 = vmatprep.subr.bf16.mxu1 %v3114_v58 }
 0x775   : > { %2752 = vmatprep.subr.bf16.mxu0 %v3127_v5 }
 0x777   : > { %1958 = vmatpush1.bf16.msra.mxu1 %v3112_v59  ;;  %v2704_v59 = vld [vmem:[%s852_s26] ss:$0 sm:$0xff] }
 0x778   : > { %1959 = vmatprep.subr.bf16.mxu1 %v3117_v60 }
 0x77b   : > { %1960 = vmatpush1.bf16.msra.mxu1 %v3115_v61  ;;  %v2705_v61 = vld [vmem:[%s860_s7] ss:$0 sm:$0xff] }
 0x77c   : > { %1961 = vmatprep.subr.bf16.mxu1 %v3120_v62 }
 0x77f   : > { %1962 = vmatpush1.bf16.msra.mxu1 %v3118_v63 }
 0x780   : > { %1963 = vmatprep.subr.bf16.mxu1 %v3123_v0 }
 0x783   : > { %1964 = vmatpush1.bf16.msra.mxu1 %v3121_v51 }
 0x784   : > { %1965 = vmatprep.subr.bf16.mxu1 %v3126_v1 }
 0x787   : > { %1966 = vmatpush1.bf16.msra.mxu1 %v3124_v2 }
 0x82d   : > { %v1454_v15 = vpop.f32.mrb[16].mxu1 }
 0x82e   : > { %v1460_v17 = vpack.c.bf16 %v1454_v15, %v1454_v15  ;;  %v2816_v18 = vpop.f32.mrb[17].mxu1  ;;  %v3138_v15 = vld [vmem:[%s4532_s13 + $0x28] sm:$0xff]  }
 0x82f   : > { %v1457_v20 = vpop.f32.mrb[18].mxu1 }
 0x830   : > { %1684 = vrot.lane.b32.xlu0 %v1460_v17, %s3789_s25  ;;  %v2817_v21 = vpop.f32.mrb[19].mxu1 }
 0x831   : > { %v2669_v21 = vld [vmem:[%s836_s18] ss:$0 sm:$0xff] }
 0x835   : > { %v1565_v22 = vpop.f32.mrb[20].mxu1 }
 0x836   : > { %v1571_v23 = vpack.c.bf16 %v1565_v22, %v1565_v22  ;;  %v2828_v25 = vpop.f32.mrb[21].mxu1 }
 0x837   : > { %v1568_v26 = vpop.f32.mrb[22].mxu1 }
 0x838   : > { %1687 = vrot.lane.b32.xlu1 %v1571_v23, %s3788_s17  ;;  %v2829_v27 = vpop.f32.mrb[23].mxu1  ;;  %v2670_v23 = vld [vmem:[%s844_s3] ss:$0 sm:$0xff] }
 0x83d   : > { %v1676_v28 = vpop.f32.mrb[24].mxu1 }
 0x83e   : > { %v1682_v29 = vpack.c.bf16 %v1676_v28, %v1676_v28  ;;  %v2840_v32 = vpop.f32.mrb[25].mxu1  ;;  %v3139_v28 = vld [vmem:[%s4532_s13 + $0x70] sm:$0xff]  }
 0x83f   : > { %v1679_v34 = vpop.f32.mrb[26].mxu1  ;;  %v3141_v32 = vld [vmem:[%s4532_s13 + $0x78] sm:$0xff]  }
 0x840   : > { %1690 = vrot.lane.b32.xlu0 %v1682_v29, %s3787_s11  ;;  %v2841_v4 = vpop.f32.mrb[27].mxu1  ;;  %v3140_v29 = vld [vmem:[%s4532_s13 + $0x30] sm:$0xff]   ;;  %v3142_v34 = vld [vmem:[%s4532_s13 + $0x38] sm:$0xff]  }
 0x841   : > { %v1859_v4 = vld [vmem:[%s4529_s16] sm:$0x3] }
 0x8a2   : > { %v1685_v35 = vpop.permute.xlu0 %1684 }
 0x8a3   : > { %v1694_v38 = vsel %vm1239_vm1, %v1346_v36, %v1685_v35  ;;  %v1864_v35 = vrot.slane %v1859_v4, %v1014_v33  ;;  %v1868_v36 = vrot.slane %v1859_v4, %v1018_v31 }
 0x8aa   : > { %v1688_v37 = vpop.permute.xlu1 %1687 }
 0x8ab   : > { %v1697_v39 = vsel %vm1695_vm4, %v1694_v38, %v1688_v37 }
 0x8b2   : > { %v1691_v40 = vpop.permute.xlu0 %1690 }
 0x8b3   : > { %v1700_v41 = vsel %vm1698_vm5, %v1697_v39, %v1691_v40 }
 0x8b4   : > { %2859 = vmatmul.mubr.bf16.vlgmr.msra.gmra.mrb[12].mxu0 %v1700_v41 }
 0x8b5   : > { %2753 = vmatpush3.bf16.msra.mxu0 %v3128_v6 }
 0x8b6   : > { %2754 = vmatprep.subr.bf16.mxu0 %v3129_v7 }
 0x8b9   : > { %2755 = vmatpush3.bf16.msra.mxu0 %v3130_v8 }
 0x8ba   : > { %2756 = vmatprep.subr.bf16.mxu0 %v3131_v9 }
 0x8bd   : > { %2757 = vmatpush3.bf16.msra.mxu0 %v3132_v10 }
 0x8be   : > { %2758 = vmatprep.subr.bf16.mxu0 %v3133_v11 }
 0x8c1   : > { %2759 = vmatpush3.bf16.msra.mxu0 %v3134_v12 }
 0x8c2   : > { %2760 = vmatprep.subr.bf16.mxu0 %v3135_v13 }
 0x8c5   : > { %2761 = vmatpush3.bf16.msra.mxu0 %v3136_v3 }
 0x8c6   : > { %2762 = vmatprep.subr.bf16.mxu0 %v3137_v14 }
 0x8c9   : > { %2763 = vmatpush3.bf16.msra.mxu0 %v3138_v15 }
 0x8ca   : > { %2764 = vmatprep.subr.bf16.mxu0 %v3139_v28 }
 0x8cd   : > { %2765 = vmatpush3.bf16.msra.mxu0 %v3140_v29 }
 0x8ce   : > { %2766 = vmatprep.subr.bf16.mxu0 %v3141_v32 }
 0x8d1   : > { %2767 = vmatpush3.bf16.msra.mxu0 %v3142_v34 }
 0x987   : > { %v1807_v43 = vpop.f32.mrb[12].mxu0 }
 0x988   : > { %v1808_v44 = vadd.f32 %v2660_v42, %v1807_v43  ;;  %v2860_v19 = vpop.f32.mrb[13].mxu0 }
 0x989   : > { %v1810_v45 = vpop.f32.mrb[14].mxu0 }
 0x98a   : > { %v2861_v46 = vpop.f32.mrb[15].mxu0  ;;  %v1813_v47 = vadd.f32 %v1808_v44, %v4591_v24 }
 0x98c   : > { %1816 = vadd.xlane.f32.xlu1 %v1813_v47 }
 0xa19   : > { %v1817_v24 = vpop.xlane.xlu1 %1816 }
 0xa1a   : > { %v1819_v55 = vmul.f32 0.0078125, %v1817_v24 }
 0xa1c   : > { %v1820_v56 = vsub.f32 %v1813_v47, %v1819_v55  ;;  %v2687_v47 = vld [vmem:[%s4977_s0] ss:$0 sm:$0xff] }
 0xa1e   : > { %v1821_v57 = vmul.f32 %v1820_v56, %v1820_v56 }
 0xa20   : > { %1822 = vadd.xlane.f32.xlu0 %v1821_v57 }
 0xaad   : > { %v1823_v16 = vpop.xlane.xlu0 %1822 }
 0xaae   : > { %v1824_v17 = vmul.f32 0.0078125, %v1823_v16 }
 0xab0   : > { %v1825_v18 = vadd.f32 1e-05, %v1824_v17 }
 0xab2   : > { %3159 = vrsqrt.f32 %v1825_v18 }
 0xabc   : > { %v3160_v20 = vpop.eup %3159 }
 0xabd   : > { %v1827_v22 = vmul.f32 %v3160_v20, %v1820_v56 }
 0xabf   : > { %v1834_v25 = vmul.f32 %v2669_v21, %v1827_v22 }
 0xac1   : > { %v1841_v26 = vadd.f32 %v2670_v23, %v1834_v25 }
 0xac3   : > { %v1842_v27 = vpack.c.bf16 %v1841_v26, %v1841_v26 }
 0xac5   : > { %1984 = vmatmul.mubr.bf16.vlgmr.msra.gmra.mrb[28].mxu1 %v1842_v27 }
 0xb98   : > { %v1985_v37 = vpop.f32.mrb[28].mxu1 }
 0xb99   : > { %v1986_v38 = vadd.f32 %v1985_v37, %v1864_v35  ;;  %v1987_v39 = vpop.f32.mrb[29].mxu1 }
 0xb9a   : > { %v1988_v40 = vadd.f32 %v1987_v39, %v1868_v36  ;;  %v1989_v41 = vpop.f32.mrb[30].mxu1 }
 0xb9b   : > { %v1992_v42 = vmax.f32 %v1986_v38, 0.0  ;;  %v1990_v43 = vpop.f32.mrb[31].mxu1 }
 0xb9c   : > { %v1993_v44 = vmax.f32 %v1988_v40, 0.0 }
 0xb9d   : > { %v1994_v45 = vpack.c.bf16 %v1992_v42, %v1992_v42 }
 0xb9e   : > { %v1995_v19 = vpack.c.bf16 %v1993_v44, %v1993_v44 }
 0xba0   : > { %2163 = vmatprep.mubr.bf16.mxu0 %v1995_v19 }
 0xba1   : > { %2164 = vmatmul.mubr.bf16.vlgmr.msra.gmra.mrb[16].mxu0 %v1994_v45 }
 0xc74   : > { %v2768_v46 = vpop.f32.mrb[16].mxu0 }
 0xc75   : > { %v2769_v48 = vpop.f32.mrb[17].mxu0 }
 0xc76   : > { %v2770_v33 = vadd.f32 %v2769_v48, %v2768_v46  ;;  %v2771_v30 = vpop.f32.mrb[18].mxu0 }
 0xc77   : > { %v2772_v31 = vpop.f32.mrb[19].mxu0 }
 0xc78   : > { %v2166_v49 = vadd.f32 %v2770_v33, %v2687_v47 }
 0xc7a   : > { %v2171_v50 = vadd.f32 %v2166_v49, %v1841_v26 }
 0xc7c   : > { %2174 = vadd.xlane.f32.xlu0 %v2171_v50 }
 0xd09   : > { %v2175_v52 = vpop.xlane.xlu0 %2174 }
 0xd0a   : > { %v2176_v53 = vmul.f32 0.0078125, %v2175_v52 }
 0xd0c   : > { %v2177_v54 = vsub.f32 %v2171_v50, %v2176_v53 }
 0xd0e   : > { %v2178_v24 = vmul.f32 %v2177_v54, %v2177_v54 }
 0xd10   : > { %2179 = vadd.xlane.f32.xlu1 %v2178_v24 }
 0xd9d   : > { %v2180_v55 = vpop.xlane.xlu1 %2179 }
 0xd9e   : > { %v2181_v56 = vmul.f32 0.0078125, %v2180_v55 }
 0xda0   : > { %v2182_v57 = vadd.f32 1e-05, %v2181_v56 }
 0xda2   : > { %3161 = vrsqrt.f32 %v2182_v57 }
 0xdab   : > { %2202 = sbr.rel (%p2706_p2) target bundleno = 3508 (0xdb4), region = 148 }
 0xdac   : > { %v3162_v58 = vpop.eup %3161 }
 0xdad   : > { %v2184_v60 = vmul.f32 %v3162_v58, %v2177_v54 }
 0xdaf   : > { %v2191_v62 = vmul.f32 %v2704_v59, %v2184_v60 }
 0xdb1   : > { %v2198_v63 = vadd.f32 %v2705_v61, %v2191_v62 }
 0xdb3   : > { %2203 = vst [vmem:[%s4559_s14] sm:$0xff] %v2198_v63 }
 0xdb4 PF: > { %s4979_s12 = sld [smem:[#allocation38_spill]] }
 0xdba   : > { %p2707_p8 = scmp.ne.s32.totalorder %s4979_s12, 1 }
 0xdbb   : > { %2210 = vadd.xlane.f32.xlu0 (!%p2707_p8), %v2198_v63  ;;  %v2708_v9 = vld [vmem:[#allocation23] ss:$0 sm:$0xff] (!%p2707_p8)  ;;  %v2709_v11 = vld [vmem:[#allocation25] ss:$0 sm:$0xff] (!%p2707_p8) }
 0xdbc   : > { %2207 = sbr.rel (%p2707_p8) target bundleno = 3827 (0xef3), region = 152 }
 0xe48   : > { %v2211_v0 = vpop.xlane.xlu0 %2210 }
 0xe49   : > { %v2212_v51 = vmul.f32 0.0078125, %v2211_v0 }
 0xe4b   : > { %v2213_v1 = vsub.f32 %v2198_v63, %v2212_v51 }
 0xe4d   : > { %v2214_v2 = vmul.f32 %v2213_v1, %v2213_v1 }
 0xe4f   : > { %2215 = vadd.xlane.f32.xlu0 %v2214_v2 }
 0xedc   : > { %v2216_v5 = vpop.xlane.xlu0 %2215 }
 0xedd   : > { %v2217_v6 = vmul.f32 0.0078125, %v2216_v5 }
 0xedf   : > { %v2218_v7 = vadd.f32 1e-05, %v2217_v6 }
 0xee1   : > { %3163 = vrsqrt.f32 %v2218_v7 }
 0xeeb   : > { %v3164_v8 = vpop.eup %3163 }
 0xeec   : > { %v2220_v10 = vmul.f32 %v3164_v8, %v2213_v1 }
 0xeee   : > { %v2227_v12 = vmul.f32 %v2708_v9, %v2220_v10 }
 0xef0   : > { %v2234_v13 = vadd.f32 %v2709_v11, %v2227_v12 }
 0xef2   : > { %2235 = vst [vmem:[%s4559_s14] sm:$0xff] %v2234_v13 }
 0xef3 PF: > { %s4980_s30 = sld [smem:[#allocation39_spill]]  ;;  %s2250_s13 = sshll.u32 %s4559_s14, 4  ;;  %s2251_s13 = int_to_ptr.vmem [resolvable:$true] %s2250_s13 }
 0xef4   : > { %s4981_s8 = sld [smem:[#allocation62_spill]]  ;;  %s2237_s6 = scalar_lea.sflag [#allocation4], %s4482_s15 }
 0xef5   : > { %s3611_s18 = scalar_lea.vmem %s2251_s13, 128  ;;  %p4982_p10 = scmp.ne.s32.totalorder %s4939_s1, 0 }
 0xef6   : > { %p3612_p1 = scmp.ne.s32.totalorder %s2251_s13, %s3611_s18  ;;  %s3790_s3 = smov [#allocation26]  }
 0xef7   : > { %s3615_s24 = sshll.u32 %s3790_s3, 4  ;;  %s3616_s24 = int_to_ptr.vmem [resolvable:$false] %s3615_s24 }
 0xef8   : > { %p3613_p3 = pnand %p3612_p1, %p4982_p10  ;;  %s3617_s26 = scalar_lea.vmem %s3616_s24, 256 }
 0xef9   : > { %s2711_s27 = sshll.u32 %s4980_s30, 7  ;;  %p3618_p0 = scmp.lt.s32.totalorder %s2251_s13, %s3616_s24 }
 0xefa   : > { %s4762_s16 = scalar_lea.hbm %s4981_s8, %s2711_s27  ;;  %p3614_p9 = pneg %p3613_p3 }
 0xefb   : > { %p3619_p11 = scmp.lt.s32.totalorder %s3617_s26, %s3611_s18 }
 0xefd   : > { %p3620_p4 = por %p3619_p11, %p3618_p0 }
 0xeff   : > { %p3621_p6 = pnand %p3620_p4, %p3614_p9 }
 0xf01   : > { %3624 = shalt.err (!%p3621_p6)
}
 0xf02   : > { %s3625_s15 = scalar_lea.hbm %s4762_s16, 128  ;;  %s3629_s11 = scalar_lea.hbm %s4981_s8, 256 }
 0xf03   : > { %p3626_p12 = scmp.ne.s32.totalorder %s4762_s16, %s3625_s15  ;;  %p3630_p13 = scmp.lt.u32.totalorder %s4762_s16, %s4981_s8 }
 0xf04   : > { %p3631_p2 = scmp.lt.u32.totalorder %s3629_s11, %s3625_s15  ;;  %p3633_p1 = scmp.lt.u32.totalorder %s3625_s15, %s4762_s16 }
 0xf05   : > { %p3627_p5 = pnand %p3626_p12, %p4982_p10 }
 0xf06   : > { %p3632_p8 = por %p3631_p2, %p3630_p13 }
 0xf07   : > { %p3628_p7 = pneg %p3627_p5 }
 0xf08   : > { %p3634_p3 = por %p3633_p1, %p3632_p8 }
 0xf0a   : > { %p3635_p9 = pnand %p3634_p3, %p3628_p7 }
 0xf0c   : > { %3638 = shalt.err (!%p3635_p9)
}
 0xf0d   : > { %2902 = dma.vmem_to_hbm [thread:$0]  (%p4982_p10), %s2251_s13, 128, %s4762_s16, %s2237_s6  }
 0xf0e PF: > { %p2960_p0 = scmp.ge.s32.totalorder %s3761_s28, 2  ;;  %s2262_s0 = sand.u32 1, %s3733_s21  }
 0xf0f   : > { %p4983_p11 = scmp.ne.s32.totalorder %s4942_s20, 0  ;;  %s2263_s9 = scalar_lea.sflag [#allocation4], %s2262_s0 }
 0xf11   : > { %p2952_p4 = pnand %p2960_p0, %p4983_p11 }
 0xf13   : > { %3716 = dma.done.wait (!%p2952_p4), %s2263_s9, 128  }
 0xf14   : > { %3718 = vsyncadd (!%p2952_p4), %s2263_s9, 4294967168  ;;  %s50_s28 = sadd.s32 1, %s3761_s28   ;;  %s4984_s18 = sld [smem:[#allocation36_spill]] }
 0xf15   : > { %p47_p6 = scmp.ge.s32.totalorder %s50_s28, 6   ;;  %s4985_s12 = sld [smem:[#allocation37_spill]] }
 0xf16   : > { %s4986_s30 = smov %s5003_s19  ;;  %s4987_s24 = sld [smem:[#allocation40_spill]] }
 0xf17   : > { %s4988_s25 = sld [smem:[#allocation41_spill]]  ;;  %s4989_s26 = sld [smem:[#allocation45_spill]] }
 0xf18   : > { %s4990_s27 = sld [smem:[#allocation46_spill]]  ;;  %s4992_s20 = smov %s4986_s30 }
 0xf19   : > { %s4993_s21 = smov %s3737_s22  ;;  %s4994_s22 = smov %s3741_s23 }
 0xf1a   : > { %s4995_s23 = smov %s4281_s4  ;;  %49 = sbr.rel (!%p47_p6) target bundleno = 39 (0x27), region = 289 }
 0xf1b   : > { %s4991_s19 = smov %s4985_s12 }
 0xf21   :  { %2268 = vsyncpa [#allocation3], 1 }
 0xf22   :  { %2270 = vsyncpa [#allocation3 + $0x1], 1 }
 0xf23   :  { %2271 = vsyncpa [#allocation6], 1 }
 0xf24   :  { %2273 = vsyncpa [#allocation6 + $0x1], 1 }
 0xf25   :  { %2274 = vsyncpa [#allocation9], 1 }
 0xf26   :  { %2276 = vsyncpa [#allocation9 + $0x1], 1 }
 0xf27   :  { %2277 = vsyncpa [#allocation12], 1 }
 0xf28   :  { %2279 = vsyncpa [#allocation12 + $0x1], 1 }
 0xf29   :  { %2280 = vsyncpa [#allocation15], 1 }
 0xf2a   :  { %2282 = vsyncpa [#allocation15 + $0x1], 1 }
 0xf2b   :  { %2283 = vsyncpa [#allocation18], 1 }
 0xf2c   :  { %2285 = vsyncpa [#allocation18 + $0x1], 1 }
 0xf2d   :  { %2286 = vsyncpa [#allocation21], 1 }
 0xf2e   :  { %2288 = vsyncpa [#allocation21 + $0x1], 1 }
 0xf2f   :  { %2289 = vsyncpa [#allocation24], 1 }
 0xf30   :  { %2290 = vsyncpa [#allocation4], 1 }
 0xf31   :  { %2292 = vsyncpa [#allocation4 + $0x1], 1 }

</bundles_post_ra>
